<compile_context>
chip_gen: v7x
topology: tpu7x:2x2x1
jax: 0.10.0
libtpu: 0.0.40
codegen_flags: <defaults>
</compile_context>

<pallas_src>
import math

import numpy as np
import jax
import jax.numpy as jnp
from jax import lax
from jax.experimental import pallas as pl
from jax.experimental.pallas import tpu as pltpu

# ------------------------------ model sizes ---------------------------------
NUM_NODES = 16      # N
NUM_FEATURES = 5    # F
NUM_HIDDENS = 16    # H == d_model (must be <= ceil(N/2)*2 for PositionalEncoding1D)
NUM_CLASSES = 3
BATCH_SIZE = 2
N_HEADS, D_K, D_V = 5, 20, 20     # fixed in the module: EncoderLayer(n_heads=5, d_k=20, d_v=20)
D_FF = 4 * NUM_HIDDENS            # TODO(synk): Transformer_with_position source not given; d_ff assumed 4*d_model
NUM_BLOCKS = 12
LN_EPS = 1e-5
NEG_INF = -1e9


# ------------------------------ host-side constants --------------------------

def _tril_gather_index(n):
    """idx[i, j] = packed lower-triangular position of (max(i,j), min(i,j))."""
    idx = np.empty((n, n), dtype=np.int32)
    for i in range(n):
        for j in range(n):
            hi, lo = (i, j) if i >= j else (j, i)
            idx[i, j] = hi * (hi + 1) // 2 + lo
    return idx


_TRIL_IDX_NP = _tril_gather_index(NUM_NODES)


def _positional_encoding_flat(num_nodes, seq_len, orig_ch, batch_size):
    """PositionalEncoding1D(channels=num_nodes) applied to (B, seq_len, orig_ch), flattened."""
    channels = int(math.ceil(num_nodes / 2) * 2)
    assert orig_ch <= channels, "num_hiddens must be <= ceil(num_nodes/2)*2"
    inv_freq = 1.0 / (10000.0 ** (np.arange(0, channels, 2, dtype=np.float32) /
                                  np.float32(channels)))
    pos = np.arange(seq_len, dtype=np.float32)
    sin_inp = np.einsum("i,j->ij", pos, inv_freq)                 # (seq_len, channels//2)
    emb = np.stack([np.sin(sin_inp), np.cos(sin_inp)], axis=-1)   # interleave sin/cos
    emb = emb.reshape(seq_len, channels)[:, :orig_ch]
    return np.tile(emb, (batch_size, 1)).astype(np.float32)       # (B*seq_len, orig_ch)


# ------------------------------ fused Pallas kernel ---------------------------

def _layer_norm(x, g, b):
    mu = jnp.mean(x, axis=-1, keepdims=True)
    xc = x - mu
    var = jnp.mean(xc * xc, axis=-1, keepdims=True)
    return xc * lax.rsqrt(var + LN_EPS) * g + b


def _fused_kernel(w_bd_ref, bias_ref, x_in_ref, pos_b0_ref,
                  sgcn0_w_ref, fc_w_ref, fc_b_ref,
                  sgcn_w_ref, sgcn_b_ref,
                  wqkv_ref, bqkv_ref, wo_ref, bo_ref,
                  ln1_g_ref, ln1_b_ref,
                  w1_ref, b1_ref, w2_ref, b2_ref,
                  ln2_g_ref, ln2_b_ref,
                  logits_ref):
    f32 = jnp.float32
    B, N, H = BATCH_SIZE, NUM_NODES, NUM_HIDDENS
    BN = B * N
    NH, DK, DV = N_HEADS, D_K, D_V
    scale = 1.0 / math.sqrt(DK)

    # ---- prologue: adjacency norm (block-diag) + SGConv(K=2) + pos enc ------
    w_bd = w_bd_ref[...]                                          # (BN, BN) block-diag W
    deg_r = jnp.sum(jnp.abs(w_bd), axis=1, keepdims=True)         # per-graph degrees
    deg_c = jnp.sum(jnp.abs(w_bd), axis=0, keepdims=True)         # (W symmetric)
    inv_r = jnp.where(deg_r > 0.0, lax.rsqrt(deg_r), 0.0)
    inv_c = jnp.where(deg_c > 0.0, lax.rsqrt(deg_c), 0.0)
    a_hat = inv_r * w_bd * inv_c                                  # D^-1/2 W D^-1/2 (block-diag)
    a2 = jnp.dot(a_hat, a_hat, preferred_element_type=f32)        # K = 2 propagation
    prop0 = jnp.dot(a2, x_in_ref[...], preferred_element_type=f32)           # (BN, F)
    x0 = jnp.dot(prop0, sgcn0_w_ref[...], preferred_element_type=f32)
    x0 = x0 + pos_b0_ref[...]                                     # + SGConv-0 bias + pos enc

    # loop-invariant attention bias (W on diag blocks, -1e9 off), tiled over heads
    bias_tiled = jnp.concatenate([bias_ref[...]] * NH, axis=0)    # (NH*BN, BN)

    # ---- 12 x (SGConv K=1 -> MHA(+bias W) -> LN1 -> FFN -> LN2 -> residual) --
    def block_body(i, x):
        prop = jnp.dot(a_hat, x, preferred_element_type=f32)                      # (BN, H)
        y = jnp.dot(prop, sgcn_w_ref[i], preferred_element_type=f32) + sgcn_b_ref[i]

        qkv = jnp.dot(y, wqkv_ref[i], preferred_element_type=f32) + bqkv_ref[i]   # (BN, 3*NH*DK)
        q = qkv[:, :NH * DK]
        k = qkv[:, NH * DK:2 * NH * DK]
        v = qkv[:, 2 * NH * DK:]

        scores = [lax.dot_general(q[:, h * DK:(h + 1) * DK],
                                  k[:, h * DK:(h + 1) * DK],
                                  (((1,), (1,)), ((), ())),
                                  preferred_element_type=f32)
                  for h in range(NH)]                                              # NH x (BN, BN)
        s_all = jnp.concatenate(scores, axis=0) * scale + bias_tiled              # (NH*BN, BN)
        s_all = s_all - jnp.max(s_all, axis=-1, keepdims=True)
        p_all = jnp.exp(s_all)
        p_all = p_all * pl.reciprocal(jnp.sum(p_all, axis=-1, keepdims=True),
                                      approx=True)
        ctx = jnp.concatenate(
            [jnp.dot(p_all[h * BN:(h + 1) * BN, :], v[:, h * DV:(h + 1) * DV],
                     preferred_element_type=f32)
             for h in range(NH)], axis=1)                                          # (BN, NH*DV)
        att = jnp.dot(ctx, wo_ref[i], preferred_element_type=f32) + bo_ref[i]      # (BN, H)

        h1 = _layer_norm(att + y, ln1_g_ref[i], ln1_b_ref[i])
        ff = jnp.maximum(jnp.dot(h1, w1_ref[i], preferred_element_type=f32) + b1_ref[i], 0.0)
        ff = jnp.dot(ff, w2_ref[i], preferred_element_type=f32) + b2_ref[i]
        h2 = _layer_norm(ff + h1, ln2_g_ref[i], ln2_b_ref[i])
        return h2 + x                                                              # residual carry

    x = lax.fori_loop(0, NUM_BLOCKS, block_body, x0)

    # ---- epilogue: global_add_pool (row sums) + fc; dropout eval-mode no-op ---
    pooled = jnp.concatenate(
        [jnp.sum(x[b * N:(b + 1) * N, :], axis=0, keepdims=True) for b in range(B)],
        axis=0)                                                                    # (B, H)
    logits_ref[...] = (jnp.dot(pooled, fc_w_ref[...], preferred_element_type=f32)
                       + fc_b_ref[...])


# ------------------------------ wrapper ---------------------------------------

def fuse_model_forward(params, x_nodes, batch_size):
    N, H, F, C, L = NUM_NODES, NUM_HIDDENS, NUM_FEATURES, NUM_CLASSES, NUM_BLOCKS
    B = batch_size
    assert batch_size == BATCH_SIZE

    # dense symmetric W = Ltri + Ltri^T - diag(diag(Ltri)) built via a gather (no scatter)
    W = jnp.take(params["edge_w"], jnp.asarray(_TRIL_IDX_NP), axis=0)        # (N, N)

    # block-diagonal adjacency & attention bias over the batch (tiny XLA ops)
    diag_mask = jnp.asarray(np.kron(np.eye(B, dtype=np.float32),
                                    np.ones((N, N), np.float32)))            # (B*N, B*N)
    W_bd = diag_mask * jnp.tile(W, (B, B))                                   # W on diag blocks
    attn_bias = jnp.where(diag_mask > 0.0, W_bd, NEG_INF)

    # positional encoding + SGConv-0 bias folded into a single additive constant
    pos_b0 = (jnp.asarray(_positional_encoding_flat(N, N, H, B))
              + params["sgcn0_b"].reshape(1, H))                             # (B*N, H)

    st = params["stacked"]

    def pack_qkv(w):            # (L, NH, H, D) -> (L, H, NH*D), column block h = head h
        return jnp.transpose(w, (0, 2, 1, 3)).reshape(L, H, N_HEADS * D_K)

    wqkv = jnp.concatenate([pack_qkv(st["wq"]), pack_qkv(st["wk"]), pack_qkv(st["wv"])],
                           axis=-1)                                          # (L, H, 3*NH*DK)
    bqkv = jnp.concatenate([st["bq"].reshape(L, 1, N_HEADS * D_K),
                            st["bk"].reshape(L, 1, N_HEADS * D_K),
                            st["bv"].reshape(L, 1, N_HEADS * D_V)], axis=-1) # (L, 1, 3*NH*DK)
    wo = st["wo"].reshape(L, N_HEADS * D_V, H)                               # (L, NH*DV, H)

    # Single invocation (no grid): every operand is a whole-array VMEM-resident
    # block (~1 MiB total padded), so there is no per-block DMA or grid overhead.
    logits = pl.pallas_call(
        _fused_kernel,
        out_shape=jax.ShapeDtypeStruct((B, C), jnp.float32),
    )(W_bd, attn_bias, x_nodes, pos_b0,
      params["sgcn0_w"], params["fc_w"], params["fc_b"].reshape(1, C),
      st["sgcn_w"], st["sgcn_b"], wqkv, bqkv, wo, st["bo"],
      st["ln1_g"], st["ln1_b"], st["w1"], st["b1"], st["w2"], st["b2"],
      st["ln2_g"], st["ln2_b"])
    return logits, W


# ------------------------------ parameter init --------------------------------

def init_params(key):
    keys = iter(jax.random.split(key, 32))

    def nrm(shape, scale):
        return scale * jax.random.normal(next(keys), shape, dtype=jnp.float32)

    H, F, N, C, L = NUM_HIDDENS, NUM_FEATURES, NUM_NODES, NUM_CLASSES, NUM_BLOCKS
    return {
        "edge_w": nrm((N * (N + 1) // 2,), 1.0),
        "sgcn0_w": nrm((F, H), 1.0 / math.sqrt(F)),
        "sgcn0_b": jnp.zeros((H,), jnp.float32),
        "fc_w": nrm((H, C), 1.0 / math.sqrt(H)),
        "fc_b": jnp.zeros((C,), jnp.float32),
        "stacked": {
            "sgcn_w": nrm((L, H, H), 1.0 / math.sqrt(H)),
            "sgcn_b": jnp.zeros((L, 1, H), jnp.float32),
            "wq": nrm((L, N_HEADS, H, D_K), 1.0 / math.sqrt(H)),
            "bq": jnp.zeros((L, N_HEADS, 1, D_K), jnp.float32),
            "wk": nrm((L, N_HEADS, H, D_K), 1.0 / math.sqrt(H)),
            "bk": jnp.zeros((L, N_HEADS, 1, D_K), jnp.float32),
            "wv": nrm((L, N_HEADS, H, D_V), 1.0 / math.sqrt(H)),
            "bv": jnp.zeros((L, N_HEADS, 1, D_V), jnp.float32),
            "wo": nrm((L, N_HEADS, D_V, H), 1.0 / math.sqrt(N_HEADS * D_V)),
            "bo": jnp.zeros((L, 1, H), jnp.float32),
            "ln1_g": jnp.ones((L, 1, H), jnp.float32),
            "ln1_b": jnp.zeros((L, 1, H), jnp.float32),
            "w1": nrm((L, H, D_FF), 1.0 / math.sqrt(H)),
            "b1": jnp.zeros((L, 1, D_FF), jnp.float32),
            "w2": nrm((L, D_FF, H), 1.0 / math.sqrt(D_FF)),
            "b2": jnp.zeros((L, 1, H), jnp.float32),
            "ln2_g": jnp.ones((L, 1, H), jnp.float32),
            "ln2_b": jnp.zeros((L, 1, H), jnp.float32),
        },
    }


# ---------------------------------- main ---------------------------------------

if __name__ == "__main__":
    key = jax.random.PRNGKey(0)
    kp, kx = jax.random.split(key)
    params = init_params(kp)
    # batch_de.x : node features of the batched graph, shape (B*N, F)
    x_nodes = jax.random.normal(kx, (BATCH_SIZE * NUM_NODES, NUM_FEATURES), dtype=jnp.float32)

    fwd = jax.jit(lambda p, x: fuse_model_forward(p, x, BATCH_SIZE))
    logits, edge_w_dense = fwd(params, x_nodes)
    jax.block_until_ready((logits, edge_w_dense))

    assert logits.shape == (BATCH_SIZE, NUM_CLASSES)
    assert edge_w_dense.shape == (NUM_NODES, NUM_NODES)
    assert bool(jnp.all(jnp.isfinite(logits)))
    print("KERNEL_OK")
</pallas_src>

<mosaic_0001>
module attributes {stable_mosaic.version = 11 : i64} {
  func.func @_fused_kernel(%arg0: memref<32x32xf32, #tpu.memory_space<vmem>>, %arg1: memref<32x32xf32, #tpu.memory_space<vmem>>, %arg2: memref<32x5xf32, #tpu.memory_space<vmem>>, %arg3: memref<32x16xf32, #tpu.memory_space<vmem>>, %arg4: memref<5x16xf32, #tpu.memory_space<vmem>>, %arg5: memref<16x3xf32, #tpu.memory_space<vmem>>, %arg6: memref<1x3xf32, #tpu.memory_space<vmem>>, %arg7: memref<12x16x16xf32, #tpu.memory_space<vmem>>, %arg8: memref<12x1x16xf32, #tpu.memory_space<vmem>>, %arg9: memref<12x16x300xf32, #tpu.memory_space<vmem>>, %arg10: memref<12x1x300xf32, #tpu.memory_space<vmem>>, %arg11: memref<12x100x16xf32, #tpu.memory_space<vmem>>, %arg12: memref<12x1x16xf32, #tpu.memory_space<vmem>>, %arg13: memref<12x1x16xf32, #tpu.memory_space<vmem>>, %arg14: memref<12x1x16xf32, #tpu.memory_space<vmem>>, %arg15: memref<12x16x64xf32, #tpu.memory_space<vmem>>, %arg16: memref<12x1x64xf32, #tpu.memory_space<vmem>>, %arg17: memref<12x64x16xf32, #tpu.memory_space<vmem>>, %arg18: memref<12x1x16xf32, #tpu.memory_space<vmem>>, %arg19: memref<12x1x16xf32, #tpu.memory_space<vmem>>, %arg20: memref<12x1x16xf32, #tpu.memory_space<vmem>>, %arg21: memref<2x3xf32, #tpu.memory_space<vmem>>) attributes {dimension_semantics = [], scalar_prefetch = 0 : i64, scratch_operands = 0 : i64, tpu.core_type = #tpu.core_type<tc>} {
    %c0 = arith.constant 0 : index
    %c0_0 = arith.constant 0 : index
    %0 = vector.load %arg0[%c0, %c0_0] : memref<32x32xf32, #tpu.memory_space<vmem>>, vector<32x32xf32>
    %1 = math.absf %0 : vector<32x32xf32>
    %cst = arith.constant dense<0.000000e+00> : vector<32xf32>
    %2 = vector.multi_reduction <add>, %1, %cst [1] : vector<32x32xf32> to vector<32xf32>
    %3 = vector.shape_cast %2 : vector<32xf32> to vector<32x1xf32>
    %4 = math.absf %0 : vector<32x32xf32>
    %cst_1 = arith.constant dense<0.000000e+00> : vector<32xf32>
    %5 = vector.multi_reduction <add>, %4, %cst_1 [0] : vector<32x32xf32> to vector<32xf32>
    %6 = vector.shape_cast %5 : vector<32xf32> to vector<1x32xf32>
    %cst_2 = arith.constant 0.000000e+00 : f32
    %7 = vector.broadcast %cst_2 : f32 to vector<32x1xf32>
    %8 = arith.cmpf ogt, %3, %7 : vector<32x1xf32>
    %9 = math.rsqrt %3 : vector<32x1xf32>
    %cst_3 = arith.constant 0.000000e+00 : f32
    %10 = vector.broadcast %cst_3 : f32 to vector<32x1xf32>
    %11 = arith.select %8, %9, %10 : vector<32x1xi1>, vector<32x1xf32>
    %cst_4 = arith.constant 0.000000e+00 : f32
    %12 = vector.broadcast %cst_4 : f32 to vector<1x32xf32>
    %13 = arith.cmpf ogt, %6, %12 : vector<1x32xf32>
    %14 = math.rsqrt %6 : vector<1x32xf32>
    %cst_5 = arith.constant 0.000000e+00 : f32
    %15 = vector.broadcast %cst_5 : f32 to vector<1x32xf32>
    %16 = arith.select %13, %14, %15 : vector<1x32xi1>, vector<1x32xf32>
    %17 = vector.broadcast %11 : vector<32x1xf32> to vector<32x32xf32>
    %18 = arith.mulf %17, %0 : vector<32x32xf32>
    %19 = vector.broadcast %16 : vector<1x32xf32> to vector<32x32xf32>
    %20 = arith.mulf %18, %19 : vector<32x32xf32>
    %cst_6 = arith.constant dense<0.000000e+00> : vector<32x32xf32>
    %21 = tpu.matmul %20, %20, %cst_6 {dimension_numbers = #tpu.dot_dimension_numbers<[1], [0], [0], [1], [0, 0, 1, 1], [], []>} : vector<32x32xf32>, vector<32x32xf32>, vector<32x32xf32> -> vector<32x32xf32>
    %c0_7 = arith.constant 0 : index
    %c0_8 = arith.constant 0 : index
    %22 = vector.load %arg2[%c0_7, %c0_8] : memref<32x5xf32, #tpu.memory_space<vmem>>, vector<32x5xf32>
    %cst_9 = arith.constant dense<0.000000e+00> : vector<32x5xf32>
    %23 = tpu.matmul %21, %22, %cst_9 {dimension_numbers = #tpu.dot_dimension_numbers<[1], [0], [0], [1], [0, 0, 1, 1], [], []>} : vector<32x32xf32>, vector<32x5xf32>, vector<32x5xf32> -> vector<32x5xf32>
    %c0_10 = arith.constant 0 : index
    %c0_11 = arith.constant 0 : index
    %24 = vector.load %arg4[%c0_10, %c0_11] : memref<5x16xf32, #tpu.memory_space<vmem>>, vector<5x16xf32>
    %cst_12 = arith.constant dense<0.000000e+00> : vector<32x16xf32>
    %25 = tpu.matmul %23, %24, %cst_12 {dimension_numbers = #tpu.dot_dimension_numbers<[1], [0], [0], [1], [0, 0, 1, 1], [], []>} : vector<32x5xf32>, vector<5x16xf32>, vector<32x16xf32> -> vector<32x16xf32>
    %c0_13 = arith.constant 0 : index
    %c0_14 = arith.constant 0 : index
    %26 = vector.load %arg3[%c0_13, %c0_14] : memref<32x16xf32, #tpu.memory_space<vmem>>, vector<32x16xf32>
    %27 = arith.addf %25, %26 : vector<32x16xf32>
    %c0_15 = arith.constant 0 : index
    %c0_16 = arith.constant 0 : index
    %28 = vector.load %arg1[%c0_15, %c0_16] : memref<32x32xf32, #tpu.memory_space<vmem>>, vector<32x32xf32>
    %29 = tpu.concatenate %28, %28, %28, %28, %28 in 0 : vector<32x32xf32>, vector<32x32xf32>, vector<32x32xf32>, vector<32x32xf32>, vector<32x32xf32> -> vector<160x32xf32>
    %c0_i32 = arith.constant 0 : i32
    %c12_i32 = arith.constant 12 : i32
    %30 = arith.addi %c0_i32, %c12_i32 : i32
    %c1_i32 = arith.constant 1 : i32
    %31 = scf.for %arg22 = %c0_i32 to %30 step %c1_i32 iter_args(%arg23 = %27) -> (vector<32x16xf32>)  : i32 {
      %cst_27 = arith.constant dense<0.000000e+00> : vector<32x16xf32>
      %45 = tpu.matmul %20, %arg23, %cst_27 {dimension_numbers = #tpu.dot_dimension_numbers<[1], [0], [0], [1], [0, 0, 1, 1], [], []>} : vector<32x32xf32>, vector<32x16xf32>, vector<32x16xf32> -> vector<32x16xf32>
      %46 = arith.index_cast %arg22 : i32 to index
      %c0_28 = arith.constant 0 : index
      %c0_29 = arith.constant 0 : index
      %47 = vector.load %arg7[%46, %c0_28, %c0_29] : memref<12x16x16xf32, #tpu.memory_space<vmem>>, vector<1x16x16xf32>
      %48 = vector.shape_cast %47 : vector<1x16x16xf32> to vector<16x16xf32>
      %cst_30 = arith.constant dense<0.000000e+00> : vector<32x16xf32>
      %49 = tpu.matmul %45, %48, %cst_30 {dimension_numbers = #tpu.dot_dimension_numbers<[1], [0], [0], [1], [0, 0, 1, 1], [], []>} : vector<32x16xf32>, vector<16x16xf32>, vector<32x16xf32> -> vector<32x16xf32>
      %50 = arith.index_cast %arg22 : i32 to index
      %c0_31 = arith.constant 0 : index
      %c0_32 = arith.constant 0 : index
      %51 = vector.load %arg8[%50, %c0_31, %c0_32] : memref<12x1x16xf32, #tpu.memory_space<vmem>>, vector<1x1x16xf32>
      %52 = vector.shape_cast %51 : vector<1x1x16xf32> to vector<1x16xf32>
      %53 = vector.broadcast %52 : vector<1x16xf32> to vector<32x16xf32>
      %54 = arith.addf %49, %53 : vector<32x16xf32>
      %55 = arith.index_cast %arg22 : i32 to index
      %c0_33 = arith.constant 0 : index
      %c0_34 = arith.constant 0 : index
      %56 = vector.load %arg9[%55, %c0_33, %c0_34] : memref<12x16x300xf32, #tpu.memory_space<vmem>>, vector<1x16x300xf32>
      %57 = vector.shape_cast %56 : vector<1x16x300xf32> to vector<16x300xf32>
      %cst_35 = arith.constant dense<0.000000e+00> : vector<32x300xf32>
      %58 = tpu.matmul %54, %57, %cst_35 {dimension_numbers = #tpu.dot_dimension_numbers<[1], [0], [0], [1], [0, 0, 1, 1], [], []>} : vector<32x16xf32>, vector<16x300xf32>, vector<32x300xf32> -> vector<32x300xf32>
      %59 = arith.index_cast %arg22 : i32 to index
      %c0_36 = arith.constant 0 : index
      %c0_37 = arith.constant 0 : index
      %60 = vector.load %arg10[%59, %c0_36, %c0_37] : memref<12x1x300xf32, #tpu.memory_space<vmem>>, vector<1x1x300xf32>
      %61 = vector.shape_cast %60 : vector<1x1x300xf32> to vector<1x300xf32>
      %62 = vector.broadcast %61 : vector<1x300xf32> to vector<32x300xf32>
      %63 = arith.addf %58, %62 : vector<32x300xf32>
      %64 = vector.extract_strided_slice %63 {offsets = [0, 0], sizes = [32, 100], strides = [1, 1]} : vector<32x300xf32> to vector<32x100xf32>
      %65 = vector.extract_strided_slice %63 {offsets = [0, 100], sizes = [32, 100], strides = [1, 1]} : vector<32x300xf32> to vector<32x100xf32>
      %66 = vector.extract_strided_slice %63 {offsets = [0, 200], sizes = [32, 100], strides = [1, 1]} : vector<32x300xf32> to vector<32x100xf32>
      %67 = vector.extract_strided_slice %64 {offsets = [0, 0], sizes = [32, 20], strides = [1, 1]} : vector<32x100xf32> to vector<32x20xf32>
      %68 = vector.extract_strided_slice %65 {offsets = [0, 0], sizes = [32, 20], strides = [1, 1]} : vector<32x100xf32> to vector<32x20xf32>
      %cst_38 = arith.constant dense<0.000000e+00> : vector<32x32xf32>
      %69 = tpu.matmul %67, %68, %cst_38 {dimension_numbers = #tpu.dot_dimension_numbers<[1], [1], [0], [0], [0, 0, 1, 0], [], []>} : vector<32x20xf32>, vector<32x20xf32>, vector<32x32xf32> -> vector<32x32xf32>
      %70 = vector.extract_strided_slice %64 {offsets = [0, 20], sizes = [32, 20], strides = [1, 1]} : vector<32x100xf32> to vector<32x20xf32>
      %71 = vector.extract_strided_slice %65 {offsets = [0, 20], sizes = [32, 20], strides = [1, 1]} : vector<32x100xf32> to vector<32x20xf32>
      %cst_39 = arith.constant dense<0.000000e+00> : vector<32x32xf32>
      %72 = tpu.matmul %70, %71, %cst_39 {dimension_numbers = #tpu.dot_dimension_numbers<[1], [1], [0], [0], [0, 0, 1, 0], [], []>} : vector<32x20xf32>, vector<32x20xf32>, vector<32x32xf32> -> vector<32x32xf32>
      %73 = vector.extract_strided_slice %64 {offsets = [0, 40], sizes = [32, 20], strides = [1, 1]} : vector<32x100xf32> to vector<32x20xf32>
      %74 = vector.extract_strided_slice %65 {offsets = [0, 40], sizes = [32, 20], strides = [1, 1]} : vector<32x100xf32> to vector<32x20xf32>
      %cst_40 = arith.constant dense<0.000000e+00> : vector<32x32xf32>
      %75 = tpu.matmul %73, %74, %cst_40 {dimension_numbers = #tpu.dot_dimension_numbers<[1], [1], [0], [0], [0, 0, 1, 0], [], []>} : vector<32x20xf32>, vector<32x20xf32>, vector<32x32xf32> -> vector<32x32xf32>
      %76 = vector.extract_strided_slice %64 {offsets = [0, 60], sizes = [32, 20], strides = [1, 1]} : vector<32x100xf32> to vector<32x20xf32>
      %77 = vector.extract_strided_slice %65 {offsets = [0, 60], sizes = [32, 20], strides = [1, 1]} : vector<32x100xf32> to vector<32x20xf32>
      %cst_41 = arith.constant dense<0.000000e+00> : vector<32x32xf32>
      %78 = tpu.matmul %76, %77, %cst_41 {dimension_numbers = #tpu.dot_dimension_numbers<[1], [1], [0], [0], [0, 0, 1, 0], [], []>} : vector<32x20xf32>, vector<32x20xf32>, vector<32x32xf32> -> vector<32x32xf32>
      %79 = vector.extract_strided_slice %64 {offsets = [0, 80], sizes = [32, 20], strides = [1, 1]} : vector<32x100xf32> to vector<32x20xf32>
      %80 = vector.extract_strided_slice %65 {offsets = [0, 80], sizes = [32, 20], strides = [1, 1]} : vector<32x100xf32> to vector<32x20xf32>
      %cst_42 = arith.constant dense<0.000000e+00> : vector<32x32xf32>
      %81 = tpu.matmul %79, %80, %cst_42 {dimension_numbers = #tpu.dot_dimension_numbers<[1], [1], [0], [0], [0, 0, 1, 0], [], []>} : vector<32x20xf32>, vector<32x20xf32>, vector<32x32xf32> -> vector<32x32xf32>
      %82 = tpu.concatenate %69, %72, %75, %78, %81 in 0 : vector<32x32xf32>, vector<32x32xf32>, vector<32x32xf32>, vector<32x32xf32>, vector<32x32xf32> -> vector<160x32xf32>
      %cst_43 = arith.constant 0.223606795 : f32
      %83 = vector.broadcast %cst_43 : f32 to vector<160x32xf32>
      %84 = arith.mulf %82, %83 : vector<160x32xf32>
      %85 = arith.addf %84, %29 : vector<160x32xf32>
      %cst_44 = arith.constant dense<0xFF800000> : vector<160xf32>
      %86 = vector.multi_reduction <maximumf>, %85, %cst_44 [1] : vector<160x32xf32> to vector<160xf32>
      %87 = vector.shape_cast %86 : vector<160xf32> to vector<160x1xf32>
      %88 = vector.broadcast %87 : vector<160x1xf32> to vector<160x32xf32>
      %89 = arith.subf %85, %88 : vector<160x32xf32>
      %90 = math.exp %89 : vector<160x32xf32>
      %cst_45 = arith.constant dense<0.000000e+00> : vector<160xf32>
      %91 = vector.multi_reduction <add>, %90, %cst_45 [1] : vector<160x32xf32> to vector<160xf32>
      %92 = vector.shape_cast %91 : vector<160xf32> to vector<160x1xf32>
      %93 = tpu.reciprocal %92 {approx = true} : vector<160x1xf32> -> vector<160x1xf32>
      %94 = vector.broadcast %93 : vector<160x1xf32> to vector<160x32xf32>
      %95 = arith.mulf %90, %94 : vector<160x32xf32>
      %96 = vector.extract_strided_slice %95 {offsets = [0, 0], sizes = [32, 32], strides = [1, 1]} : vector<160x32xf32> to vector<32x32xf32>
      %97 = vector.extract_strided_slice %66 {offsets = [0, 0], sizes = [32, 20], strides = [1, 1]} : vector<32x100xf32> to vector<32x20xf32>
      %cst_46 = arith.constant dense<0.000000e+00> : vector<32x20xf32>
      %98 = tpu.matmul %96, %97, %cst_46 {dimension_numbers = #tpu.dot_dimension_numbers<[1], [0], [0], [1], [0, 0, 1, 1], [], []>} : vector<32x32xf32>, vector<32x20xf32>, vector<32x20xf32> -> vector<32x20xf32>
      %99 = vector.extract_strided_slice %95 {offsets = [32, 0], sizes = [32, 32], strides = [1, 1]} : vector<160x32xf32> to vector<32x32xf32>
      %100 = vector.extract_strided_slice %66 {offsets = [0, 20], sizes = [32, 20], strides = [1, 1]} : vector<32x100xf32> to vector<32x20xf32>
      %cst_47 = arith.constant dense<0.000000e+00> : vector<32x20xf32>
      %101 = tpu.matmul %99, %100, %cst_47 {dimension_numbers = #tpu.dot_dimension_numbers<[1], [0], [0], [1], [0, 0, 1, 1], [], []>} : vector<32x32xf32>, vector<32x20xf32>, vector<32x20xf32> -> vector<32x20xf32>
      %102 = vector.extract_strided_slice %95 {offsets = [64, 0], sizes = [32, 32], strides = [1, 1]} : vector<160x32xf32> to vector<32x32xf32>
      %103 = vector.extract_strided_slice %66 {offsets = [0, 40], sizes = [32, 20], strides = [1, 1]} : vector<32x100xf32> to vector<32x20xf32>
      %cst_48 = arith.constant dense<0.000000e+00> : vector<32x20xf32>
      %104 = tpu.matmul %102, %103, %cst_48 {dimension_numbers = #tpu.dot_dimension_numbers<[1], [0], [0], [1], [0, 0, 1, 1], [], []>} : vector<32x32xf32>, vector<32x20xf32>, vector<32x20xf32> -> vector<32x20xf32>
      %105 = vector.extract_strided_slice %95 {offsets = [96, 0], sizes = [32, 32], strides = [1, 1]} : vector<160x32xf32> to vector<32x32xf32>
      %106 = vector.extract_strided_slice %66 {offsets = [0, 60], sizes = [32, 20], strides = [1, 1]} : vector<32x100xf32> to vector<32x20xf32>
      %cst_49 = arith.constant dense<0.000000e+00> : vector<32x20xf32>
      %107 = tpu.matmul %105, %106, %cst_49 {dimension_numbers = #tpu.dot_dimension_numbers<[1], [0], [0], [1], [0, 0, 1, 1], [], []>} : vector<32x32xf32>, vector<32x20xf32>, vector<32x20xf32> -> vector<32x20xf32>
      %108 = vector.extract_strided_slice %95 {offsets = [128, 0], sizes = [32, 32], strides = [1, 1]} : vector<160x32xf32> to vector<32x32xf32>
      %109 = vector.extract_strided_slice %66 {offsets = [0, 80], sizes = [32, 20], strides = [1, 1]} : vector<32x100xf32> to vector<32x20xf32>
      %cst_50 = arith.constant dense<0.000000e+00> : vector<32x20xf32>
      %110 = tpu.matmul %108, %109, %cst_50 {dimension_numbers = #tpu.dot_dimension_numbers<[1], [0], [0], [1], [0, 0, 1, 1], [], []>} : vector<32x32xf32>, vector<32x20xf32>, vector<32x20xf32> -> vector<32x20xf32>
      %111 = tpu.concatenate %98, %101, %104, %107, %110 in 1 : vector<32x20xf32>, vector<32x20xf32>, vector<32x20xf32>, vector<32x20xf32>, vector<32x20xf32> -> vector<32x100xf32>
      %112 = arith.index_cast %arg22 : i32 to index
      %c0_51 = arith.constant 0 : index
      %c0_52 = arith.constant 0 : index
      %113 = vector.load %arg11[%112, %c0_51, %c0_52] : memref<12x100x16xf32, #tpu.memory_space<vmem>>, vector<1x100x16xf32>
      %114 = vector.shape_cast %113 : vector<1x100x16xf32> to vector<100x16xf32>
      %cst_53 = arith.constant dense<0.000000e+00> : vector<32x16xf32>
      %115 = tpu.matmul %111, %114, %cst_53 {dimension_numbers = #tpu.dot_dimension_numbers<[1], [0], [0], [1], [0, 0, 1, 1], [], []>} : vector<32x100xf32>, vector<100x16xf32>, vector<32x16xf32> -> vector<32x16xf32>
      %116 = arith.index_cast %arg22 : i32 to index
      %c0_54 = arith.constant 0 : index
      %c0_55 = arith.constant 0 : index
      %117 = vector.load %arg12[%116, %c0_54, %c0_55] : memref<12x1x16xf32, #tpu.memory_space<vmem>>, vector<1x1x16xf32>
      %118 = vector.shape_cast %117 : vector<1x1x16xf32> to vector<1x16xf32>
      %119 = vector.broadcast %118 : vector<1x16xf32> to vector<32x16xf32>
      %120 = arith.addf %115, %119 : vector<32x16xf32>
      %121 = arith.addf %120, %54 : vector<32x16xf32>
      %122 = arith.index_cast %arg22 : i32 to index
      %c0_56 = arith.constant 0 : index
      %c0_57 = arith.constant 0 : index
      %123 = vector.load %arg13[%122, %c0_56, %c0_57] : memref<12x1x16xf32, #tpu.memory_space<vmem>>, vector<1x1x16xf32>
      %124 = vector.shape_cast %123 : vector<1x1x16xf32> to vector<1x16xf32>
      %125 = arith.index_cast %arg22 : i32 to index
      %c0_58 = arith.constant 0 : index
      %c0_59 = arith.constant 0 : index
      %126 = vector.load %arg14[%125, %c0_58, %c0_59] : memref<12x1x16xf32, #tpu.memory_space<vmem>>, vector<1x1x16xf32>
      %127 = vector.shape_cast %126 : vector<1x1x16xf32> to vector<1x16xf32>
      %cst_60 = arith.constant dense<0.000000e+00> : vector<32xf32>
      %128 = vector.multi_reduction <add>, %121, %cst_60 [1] : vector<32x16xf32> to vector<32xf32>
      %129 = vector.shape_cast %128 : vector<32xf32> to vector<32x1xf32>
      %cst_61 = arith.constant 1.600000e+01 : f32
      %130 = vector.broadcast %cst_61 : f32 to vector<32x1xf32>
      %131 = arith.divf %129, %130 : vector<32x1xf32>
      %132 = vector.broadcast %131 : vector<32x1xf32> to vector<32x16xf32>
      %133 = arith.subf %121, %132 : vector<32x16xf32>
      %134 = arith.mulf %133, %133 : vector<32x16xf32>
      %cst_62 = arith.constant dense<0.000000e+00> : vector<32xf32>
      %135 = vector.multi_reduction <add>, %134, %cst_62 [1] : vector<32x16xf32> to vector<32xf32>
      %136 = vector.shape_cast %135 : vector<32xf32> to vector<32x1xf32>
      %cst_63 = arith.constant 1.600000e+01 : f32
      %137 = vector.broadcast %cst_63 : f32 to vector<32x1xf32>
      %138 = arith.divf %136, %137 : vector<32x1xf32>
      %cst_64 = arith.constant 9.99999974E-6 : f32
      %139 = vector.broadcast %cst_64 : f32 to vector<32x1xf32>
      %140 = arith.addf %138, %139 : vector<32x1xf32>
      %141 = math.rsqrt %140 : vector<32x1xf32>
      %142 = vector.broadcast %141 : vector<32x1xf32> to vector<32x16xf32>
      %143 = arith.mulf %133, %142 : vector<32x16xf32>
      %144 = vector.broadcast %124 : vector<1x16xf32> to vector<32x16xf32>
      %145 = arith.mulf %143, %144 : vector<32x16xf32>
      %146 = vector.broadcast %127 : vector<1x16xf32> to vector<32x16xf32>
      %147 = arith.addf %145, %146 : vector<32x16xf32>
      %148 = arith.index_cast %arg22 : i32 to index
      %c0_65 = arith.constant 0 : index
      %c0_66 = arith.constant 0 : index
      %149 = vector.load %arg15[%148, %c0_65, %c0_66] : memref<12x16x64xf32, #tpu.memory_space<vmem>>, vector<1x16x64xf32>
      %150 = vector.shape_cast %149 : vector<1x16x64xf32> to vector<16x64xf32>
      %cst_67 = arith.constant dense<0.000000e+00> : vector<32x64xf32>
      %151 = tpu.matmul %147, %150, %cst_67 {dimension_numbers = #tpu.dot_dimension_numbers<[1], [0], [0], [1], [0, 0, 1, 1], [], []>} : vector<32x16xf32>, vector<16x64xf32>, vector<32x64xf32> -> vector<32x64xf32>
      %152 = arith.index_cast %arg22 : i32 to index
      %c0_68 = arith.constant 0 : index
      %c0_69 = arith.constant 0 : index
      %153 = vector.load %arg16[%152, %c0_68, %c0_69] : memref<12x1x64xf32, #tpu.memory_space<vmem>>, vector<1x1x64xf32>
      %154 = vector.shape_cast %153 : vector<1x1x64xf32> to vector<1x64xf32>
      %155 = vector.broadcast %154 : vector<1x64xf32> to vector<32x64xf32>
      %156 = arith.addf %151, %155 : vector<32x64xf32>
      %cst_70 = arith.constant 0.000000e+00 : f32
      %157 = vector.broadcast %cst_70 : f32 to vector<32x64xf32>
      %158 = arith.maximumf %156, %157 : vector<32x64xf32>
      %159 = arith.index_cast %arg22 : i32 to index
      %c0_71 = arith.constant 0 : index
      %c0_72 = arith.constant 0 : index
      %160 = vector.load %arg17[%159, %c0_71, %c0_72] : memref<12x64x16xf32, #tpu.memory_space<vmem>>, vector<1x64x16xf32>
      %161 = vector.shape_cast %160 : vector<1x64x16xf32> to vector<64x16xf32>
      %cst_73 = arith.constant dense<0.000000e+00> : vector<32x16xf32>
      %162 = tpu.matmul %158, %161, %cst_73 {dimension_numbers = #tpu.dot_dimension_numbers<[1], [0], [0], [1], [0, 0, 1, 1], [], []>} : vector<32x64xf32>, vector<64x16xf32>, vector<32x16xf32> -> vector<32x16xf32>
      %163 = arith.index_cast %arg22 : i32 to index
      %c0_74 = arith.constant 0 : index
      %c0_75 = arith.constant 0 : index
      %164 = vector.load %arg18[%163, %c0_74, %c0_75] : memref<12x1x16xf32, #tpu.memory_space<vmem>>, vector<1x1x16xf32>
      %165 = vector.shape_cast %164 : vector<1x1x16xf32> to vector<1x16xf32>
      %166 = vector.broadcast %165 : vector<1x16xf32> to vector<32x16xf32>
      %167 = arith.addf %162, %166 : vector<32x16xf32>
      %168 = arith.addf %167, %147 : vector<32x16xf32>
      %169 = arith.index_cast %arg22 : i32 to index
      %c0_76 = arith.constant 0 : index
      %c0_77 = arith.constant 0 : index
      %170 = vector.load %arg19[%169, %c0_76, %c0_77] : memref<12x1x16xf32, #tpu.memory_space<vmem>>, vector<1x1x16xf32>
      %171 = vector.shape_cast %170 : vector<1x1x16xf32> to vector<1x16xf32>
      %172 = arith.index_cast %arg22 : i32 to index
      %c0_78 = arith.constant 0 : index
      %c0_79 = arith.constant 0 : index
      %173 = vector.load %arg20[%172, %c0_78, %c0_79] : memref<12x1x16xf32, #tpu.memory_space<vmem>>, vector<1x1x16xf32>
      %174 = vector.shape_cast %173 : vector<1x1x16xf32> to vector<1x16xf32>
      %cst_80 = arith.constant dense<0.000000e+00> : vector<32xf32>
      %175 = vector.multi_reduction <add>, %168, %cst_80 [1] : vector<32x16xf32> to vector<32xf32>
      %176 = vector.shape_cast %175 : vector<32xf32> to vector<32x1xf32>
      %cst_81 = arith.constant 1.600000e+01 : f32
      %177 = vector.broadcast %cst_81 : f32 to vector<32x1xf32>
      %178 = arith.divf %176, %177 : vector<32x1xf32>
      %179 = vector.broadcast %178 : vector<32x1xf32> to vector<32x16xf32>
      %180 = arith.subf %168, %179 : vector<32x16xf32>
      %181 = arith.mulf %180, %180 : vector<32x16xf32>
      %cst_82 = arith.constant dense<0.000000e+00> : vector<32xf32>
      %182 = vector.multi_reduction <add>, %181, %cst_82 [1] : vector<32x16xf32> to vector<32xf32>
      %183 = vector.shape_cast %182 : vector<32xf32> to vector<32x1xf32>
      %cst_83 = arith.constant 1.600000e+01 : f32
      %184 = vector.broadcast %cst_83 : f32 to vector<32x1xf32>
      %185 = arith.divf %183, %184 : vector<32x1xf32>
      %cst_84 = arith.constant 9.99999974E-6 : f32
      %186 = vector.broadcast %cst_84 : f32 to vector<32x1xf32>
      %187 = arith.addf %185, %186 : vector<32x1xf32>
      %188 = math.rsqrt %187 : vector<32x1xf32>
      %189 = vector.broadcast %188 : vector<32x1xf32> to vector<32x16xf32>
      %190 = arith.mulf %180, %189 : vector<32x16xf32>
      %191 = vector.broadcast %171 : vector<1x16xf32> to vector<32x16xf32>
      %192 = arith.mulf %190, %191 : vector<32x16xf32>
      %193 = vector.broadcast %174 : vector<1x16xf32> to vector<32x16xf32>
      %194 = arith.addf %192, %193 : vector<32x16xf32>
      %195 = arith.addf %194, %arg23 : vector<32x16xf32>
      scf.yield %195 : vector<32x16xf32>
    }
    %c12_i32_17 = arith.constant 12 : i32
    %32 = vector.extract_strided_slice %31 {offsets = [0, 0], sizes = [16, 16], strides = [1, 1]} : vector<32x16xf32> to vector<16x16xf32>
    %cst_18 = arith.constant dense<0.000000e+00> : vector<16xf32>
    %33 = vector.multi_reduction <add>, %32, %cst_18 [0] : vector<16x16xf32> to vector<16xf32>
    %34 = vector.shape_cast %33 : vector<16xf32> to vector<1x16xf32>
    %35 = vector.extract_strided_slice %31 {offsets = [16, 0], sizes = [16, 16], strides = [1, 1]} : vector<32x16xf32> to vector<16x16xf32>
    %cst_19 = arith.constant dense<0.000000e+00> : vector<16xf32>
    %36 = vector.multi_reduction <add>, %35, %cst_19 [0] : vector<16x16xf32> to vector<16xf32>
    %37 = vector.shape_cast %36 : vector<16xf32> to vector<1x16xf32>
    %38 = tpu.concatenate %34, %37 in 0 : vector<1x16xf32>, vector<1x16xf32> -> vector<2x16xf32>
    %c0_20 = arith.constant 0 : index
    %c0_21 = arith.constant 0 : index
    %39 = vector.load %arg5[%c0_20, %c0_21] : memref<16x3xf32, #tpu.memory_space<vmem>>, vector<16x3xf32>
    %cst_22 = arith.constant dense<0.000000e+00> : vector<2x3xf32>
    %40 = tpu.matmul %38, %39, %cst_22 {dimension_numbers = #tpu.dot_dimension_numbers<[1], [0], [0], [1], [0, 0, 1, 1], [], []>} : vector<2x16xf32>, vector<16x3xf32>, vector<2x3xf32> -> vector<2x3xf32>
    %c0_23 = arith.constant 0 : index
    %c0_24 = arith.constant 0 : index
    %41 = vector.load %arg6[%c0_23, %c0_24] : memref<1x3xf32, #tpu.memory_space<vmem>>, vector<1x3xf32>
    %42 = vector.broadcast %41 : vector<1x3xf32> to vector<2x3xf32>
    %43 = arith.addf %40, %42 : vector<2x3xf32>
    %c0_25 = arith.constant 0 : index
    %c0_26 = arith.constant 0 : index
    %44 = vector.load %arg21[%c0_25, %c0_26] : memref<2x3xf32, #tpu.memory_space<vmem>>, vector<2x3xf32>
    tpu.vector_store %arg21[%c0_25, %c0_26], %43 {strides = array<i32>} : memref<2x3xf32, #tpu.memory_space<vmem>>, vector<2x3xf32>,
    return
  }
}

</mosaic_0001>

<bundles_post_ra>
// kernel: _lambda_.1
= control target key start
LH: loop header
LB: loop body
LE: loop exit
PB: predicated region body
PF: predicated region fallthrough
CT: control target
= control target key end

     0   :  { %s4998_s0 = inlined_call_operand.vmem [shape: f32[32,32], index: 0, kind: input, shape index: {}]   ;;  %s4999_s1 = inlined_call_operand.vmem [shape: f32[32,32], index: 1, kind: input, shape index: {}]   ;;  %s5000_s2 = inlined_call_operand.vmem [shape: f32[32,5], index: 2, kind: input, shape index: {}]   ;;  %s5001_s3 = inlined_call_operand.vmem [shape: f32[32,16], index: 3, kind: input, shape index: {}]   ;;  %s5002_s4 = inlined_call_operand.vmem [shape: f32[5,16], index: 4, kind: input, shape index: {}]   ;;  %s5003_s5 = inlined_call_operand.vmem [shape: f32[16,3], index: 5, kind: input, shape index: {}]   ;;  %s5004_s6 = inlined_call_operand.vmem [shape: f32[1,3], index: 6, kind: input, shape index: {}]   ;;  %s5005_s7 = inlined_call_operand.vmem [shape: f32[12,16,16], index: 7, kind: input, shape index: {}]   ;;  %s5006_s8 = inlined_call_operand.vmem [shape: f32[12,1,16], index: 8, kind: input, shape index: {}]   ;;  %s5007_s9 = inlined_call_operand.vmem [shape: f32[12,16,300], index: 9, kind: input, shape index: {}]   ;;  %s5008_s10 = inlined_call_operand.vmem [shape: f32[12,1,300], index: 10, kind: input, shape index: {}]   ;;  %s5009_s11 = inlined_call_operand.vmem [shape: f32[12,100,16], index: 11, kind: input, shape index: {}]   ;;  %s5010_s12 = inlined_call_operand.vmem [shape: f32[12,1,16], index: 12, kind: input, shape index: {}]   ;;  %s5011_s13 = inlined_call_operand.vmem [shape: f32[12,1,16], index: 13, kind: input, shape index: {}]   ;;  %s5012_s14 = inlined_call_operand.vmem [shape: f32[12,1,16], index: 14, kind: input, shape index: {}]   ;;  %s5013_s15 = inlined_call_operand.vmem [shape: f32[12,16,64], index: 15, kind: input, shape index: {}]   ;;  %s5014_s16 = inlined_call_operand.vmem [shape: f32[12,1,64], index: 16, kind: input, shape index: {}]   ;;  %s5015_s17 = inlined_call_operand.vmem [shape: f32[12,64,16], index: 17, kind: input, shape index: {}]   ;;  %s5016_s18 = inlined_call_operand.vmem [shape: f32[12,1,16], index: 18, kind: input, shape index: {}]   ;;  %s5017_s19 = inlined_call_operand.vmem [shape: f32[12,1,16], index: 19, kind: input, shape index: {}]   ;;  %s5018_s20 = inlined_call_operand.vmem [shape: f32[12,1,16], index: 20, kind: input, shape index: {}]   ;;  %s5019_s21 = inlined_call_operand.hbm [shape: f32[2,3], index: 21, kind: output, shape index: {}]  }
   0x1   :  { %5025 = sst [smem:[#allocation5_spill]] %s4998_s0 }
   0x2   :  { %5026 = sst [smem:[#allocation6_spill]] %s4999_s1 }
   0x3   :  { %5027 = sst [smem:[#allocation7_spill]] %s5000_s2 }
   0x4   :  { %5028 = sst [smem:[#allocation8_spill]] %s5001_s3 }
   0x5   :  { %5029 = sst [smem:[#allocation9_spill]] %s5002_s4 }
   0x6   :  { %5030 = sst [smem:[#allocation10_spill]] %s5003_s5 }
   0x7   :  { %s5031_s26 = sld [smem:[#allocation5_spill]]  ;;  %vm77_vm0 = vcmask 261120  }
   0xd   :  { %v4257_v0 = vld [vmem:[%s5031_s26 + $0x10] sm:$0xff]  ;;  %v69_v1 = vld [vmem:[%s5031_s26] sm:$0xff]  ;;  %v72_v2 = vld [vmem:[%s5031_s26 + $0x18] sm:$0xff] }
   0xe   :  { %v75_v3 = vand.u32 2147483647, %v4257_v0  ;;  %v73_v4 = vand.u32 2147483647, %v69_v1  ;;  %v76_v5 = vand.u32 2147483647, %v72_v2 }
   0xf   :  { %v70_v6 = vld [vmem:[%s5031_s26 + $0x8] sm:$0xff] }
  0x10   :  { %26 = vsyncpa [#allocation3], 0  ;;  %v84_v7 = vsel %vm77_vm0, %v75_v3, 0.0  ;;  %v78_v8 = vsel %vm77_vm0, %v73_v4, 0.0  ;;  %v74_v9 = vand.u32 2147483647, %v70_v6 }
  0x11   :  { %85 = vadd.xlane.f32.xlu1 %v84_v7  ;;  %79 = vadd.xlane.f32.xlu0 %v78_v8  ;;  %v87_v10 = vsel %vm77_vm0, %v76_v5, 0.0  ;;  %s5032_s22 = sld [smem:[#allocation7_spill]]  ;;  %s5033_s28 = sld [smem:[#allocation9_spill]]  ;;  %vm338_vm6 = vcmask 1044480   ;;  %vm325_vm7 = vcmask 39936  }
  0x12   :  { %v81_v11 = vsel %vm77_vm0, %v74_v9, 0.0  ;;  %s5034_s4 = sld [smem:[#allocation6_spill]]  ;;  %s5035_s26 = sld [smem:[#allocation8_spill]] }
  0x13   :  { %v90_v12 = vadd.f32 %v81_v11, %v78_v8 }
  0x15   :  { %88 = vadd.xlane.f32.xlu1 %v87_v10  ;;  %82 = vadd.xlane.f32.xlu0 %v81_v11  ;;  %v91_v13 = vadd.f32 %v90_v12, %v84_v7 }
  0x17   :  { %v92_v14 = vadd.f32 %v91_v13, %v87_v10  ;;  %v219_v15 = vld [vmem:[%s5032_s22] sm:$0xff]  ;;  %v220_v16 = vld [vmem:[%s5032_s22 + $0x8] sm:$0xff]  ;;  %v221_v17 = vld [vmem:[%s5032_s22 + $0x10] sm:$0xff] }
  0x18   :  { %v3591_v18 = vpack.c.bf16 %v220_v16, %v219_v15  ;;  %v222_v19 = vld [vmem:[%s5032_s22 + $0x18] sm:$0xff]  ;;  %v320_v51 = vld [vmem:[%s5033_s28] sm:$0x1f]  ;;  %v4321_v61 = vld [vmem:[%s5034_s4 + $0x8] sm:$0xff] }
  0x19   :  { %v3595_v20 = vpack.c.bf16 %v222_v19, %v221_v17  ;;  %v93_v21 = vrot.slane %v92_v14, 4  ;;  %v4316_v60 = vld [vmem:[%s5034_s4] sm:$0xff]  ;;  %v4326_v62 = vld [vmem:[%s5034_s4 + $0x10] sm:$0xff]  ;;  %v4331_v63 = vld [vmem:[%s5034_s4 + $0x18] sm:$0xff]  ;;  %s4353_s4 = smov 0  }
  0x1a   :  { %3592 = vmatprep.subr.bf16.mxu1 %v3591_v18  ;;  %v323_v7 = vld [vmem:[%s5035_s26 + $0x10] sm:$0xff] }
  0x1b   :  { %3594 = vmatpush3.bf16.msra.mxu1 %v3591_v18  ;;  %v94_v22 = vadd.f32 %v93_v21, %v92_v14 }
  0x1c   :  { %3596 = vmatprep.subr.bf16.mxu1 %v3595_v20 }
  0x1d   :  { %v95_v23 = vrot.slane %v94_v22, 2 }
  0x1f   :  { %3598 = vmatpush3.bf16.msra.mxu1 %v3595_v20  ;;  %v96_v24 = vadd.f32 %v95_v23, %v94_v22 }
  0x20   :  { %3766 = vmatprep.subr.msk.mxu1 %vm338_vm6, %v320_v51 }
  0x21   :  { %v97_v25 = vrot.slane %v96_v24, 1 }
  0x23   :  { %v98_v26 = vadd.f32 %v97_v25, %v96_v24 }
  0x25   :  { %3831 = vrsqrt.f32 %v98_v26  ;;  %vm111_vm1 = vcmp.gt.f32.partialorder %v98_v26, 0.0 }
  0x2f   :  { %v3832_v31 = vpop.eup %3831 }
  0x30   :  { %v113_v35 = vsel %vm111_vm1, %v3832_v31, 0.0 }
  0x9e   :  { %v86_v27 = vpop.xlane.xlu1 %85  ;;  %v80_v28 = vpop.xlane.xlu0 %79 }
  0x9f   :  { %3833 = vrsqrt.f32 %v86_v27  ;;  %vm99_vm2 = vcmp.gt.f32.partialorder %v80_v28, 0.0  ;;  %vm101_vm3 = vcmp.gt.f32.partialorder %v86_v27, 0.0 }
  0xa0   :  { %3835 = vrsqrt.f32 %v80_v28 }
  0xa2   :  { %v89_v29 = vpop.xlane.xlu1 %88  ;;  %v83_v30 = vpop.xlane.xlu0 %82 }
  0xa3   :  { %3837 = vrsqrt.f32 %v89_v29  ;;  %vm102_vm4 = vcmp.gt.f32.partialorder %v89_v29, 0.0  ;;  %vm100_vm5 = vcmp.gt.f32.partialorder %v83_v30, 0.0 }
  0xa4   :  { %3839 = vrsqrt.f32 %v83_v30 }
  0xa9   :  { %v3834_v32 = vpop.eup %3833 }
  0xaa   :  { %v3836_v33 = vpop.eup %3835  ;;  %v109_v38 = vsel %vm101_vm3, %v3834_v32, 0.0 }
  0xab   :  { %v107_v34 = vsel %vm99_vm2, %v3836_v33, 0.0  ;;  %v116_v44 = vmul.f32 %v109_v38, %v4257_v0  ;;  %v322_v0 = vld [vmem:[%s5035_s26 + $0x8] sm:$0xff] }
  0xac   :  { %v114_v36 = vmul.f32 %v107_v34, %v69_v1  ;;  %v321_v1 = vld [vmem:[%s5035_s26] sm:$0xff] }
  0xad   :  { %v3838_v37 = vpop.eup %3837  ;;  %v4296_v49 = vmul.f32 %v116_v44, %v113_v35 }
  0xae   :  { %v3840_v39 = vpop.eup %3839  ;;  %v110_v40 = vsel %vm102_vm4, %v3838_v37, 0.0  ;;  %v4285_v41 = vmul.f32 %v114_v36, %v113_v35 }
  0xaf   :  { %v117_v42 = vmul.f32 %v110_v40, %v72_v2  ;;  %v108_v43 = vsel %vm100_vm5, %v3840_v39, 0.0 }
  0xb0   :  { %v115_v45 = vmul.f32 %v108_v43, %v70_v6  ;;  %3310 = vmatprep.mubr.msk.f32.mxu0 %vm77_vm0, %v4285_v41  ;;  %v324_v6 = vld [vmem:[%s5035_s26 + $0x18] sm:$0xff] }
  0xb1   :  { %v4290_v46 = vmul.f32 %v117_v42, %v113_v35 }
  0xb2   :  { %v4292_v47 = vmul.f32 %v115_v45, %v113_v35 }
  0xb3   :  { %v3587_v50 = vpack.c.bf16 %v4290_v46, %v4296_v49 }
  0xb4   :  { %v3583_v48 = vpack.c.bf16 %v4292_v47, %v4285_v41 }
  0xb6   :  { %3584 = vmatprep.subr.bf16.mxu0 %v3583_v48 }
  0xb7   :  { %3586 = vmatpush3.bf16.msra.mxu0 %v3583_v48 }
  0xb8   :  { %3588 = vmatprep.subr.bf16.mxu0 %v3587_v50 }
  0xbb   :  { %3590 = vmatpush3.bf16.msra.mxu0 %v3587_v50 }
  0xbc   :  { %3330 = vmatprep.subr.msk.mxu0 %vm338_vm6, %v320_v51 }
  0xbe   :  { %3311 = vmatmul.mubr.msk.f32.vlgmr.msra.gmra.mrb[0].mxu0 %vm77_vm0, %v4292_v47 }
  0xbf   :  { %3313 = vmatprep.mubr.msk.f32.mxu0 %vm77_vm0, %v4296_v49  ;;  %3331 = vmatpush3.msk.msra.mxu0 %vm338_vm6, %v320_v51 }
  0xc2   :  { %3314 = vmatmul.mubr.msk.f32.gmra.mrb[2].mxu0 %vm77_vm0, %v4290_v46 }
 0x191   :  { %v3312_v52 = vpop.f32.mrb[0].mxu0 }
 0x192   :  { %v200_v53 = vpop.f32.mrb[1].mxu0 }
 0x193   :  { %3324 = vmatprep.mubr.msk.f32.mxu1 %vm77_vm0, %v200_v53 }
 0x194   :  { %3325 = vmatmul.mubr.msk.f32.vlgmr.msra.gmra.mrb[0].mxu1 %vm77_vm0, %v3312_v52 }
 0x195   :  { %v3315_v54 = vpop.f32.mrb[2].mxu0  ;;  %3767 = vmatpush3.msk.msra.mxu1 %vm338_vm6, %v320_v51 }
 0x196   :  { %v210_v55 = vpop.f32.mrb[3].mxu0 }
 0x197   :  { %3327 = vmatprep.mubr.msk.f32.mxu1 %vm77_vm0, %v210_v55 }
 0x198   :  { %3328 = vmatmul.mubr.msk.f32.gmra.mrb[2].mxu1 %vm77_vm0, %v3315_v54 }
 0x267   :  { %v3326_v56 = vpop.f32.mrb[0].mxu1 }
 0x268   :  { %v301_v57 = vpop.f32.mrb[1].mxu1 }
 0x269   :  { %3332 = vmatprep.mubr.msk.f32.mxu0 %vm325_vm7, %v301_v57 }
 0x26a   :  { %3333 = vmatmul.mubr.msk.f32.vlgmr.msra.gmra.mrb[4].mxu0 %vm325_vm7, %v3326_v56 }
 0x26b   :  { %v3329_v58 = vpop.f32.mrb[2].mxu1 }
 0x26c   :  { %v311_v59 = vpop.f32.mrb[3].mxu1 }
 0x26d   :  { %3335 = vmatprep.mubr.msk.f32.mxu1 %vm325_vm7, %v311_v59 }
 0x26e   :  { %3336 = vmatmul.mubr.msk.f32.vlgmr.msra.gmra.mrb[4].mxu1 %vm325_vm7, %v3329_v58 }
 0x33d   :  { %v3334_v2 = vpop.f32.mrb[4].mxu0 }
 0x33e   :  { %v414_v3 = vadd.f32 %v3334_v2, %v322_v0   ;;  %v408_v4 = vpop.f32.mrb[5].mxu0 }
 0x33f   :  { %v409_v5 = vadd.f32 %v408_v4, %v321_v1  }
 0x341   :  { %v3337_v8 = vpop.f32.mrb[4].mxu1 }
 0x342   :  { %v424_v9 = vadd.f32 %v3337_v8, %v324_v6   ;;  %v418_v10 = vpop.f32.mrb[5].mxu1 }
 0x343   :  { %v419_v11 = vadd.f32 %v418_v10, %v323_v7  }
 0x344 LB: > { %3346 = vmatprep.mubr.msk.f32.mxu0 %vm77_vm0, %v4285_v41  ;;  %v3599_v12 = vpack.c.bf16 %v4111_v3, %v4115_v5  ;;  %v3603_v13 = vpack.c.bf16 %v4103_v9, %v4107_v11  ;;  %s3044_s5 = sshll.u32 %s4119_s4, 4  ;;  %s3142_s24 = smul.u32 48, %s4119_s4  ;;  %vm538_vm8 = vcmask 130048   ;;  %v4121_v30 = vmov 0.0   ;;  %s4119_s4 = sphi %s4353_s4, %s436_s4   ;;  %v4115_v5 = vphi %v409_v5, %v5041_v5   ;;  %v4111_v3 = vphi %v414_v3, %v5040_v3   ;;  %v4107_v11 = vphi %v419_v11, %v5039_v11   ;;  %v4103_v9 = vphi %v424_v9, %v5038_v9  }
 0x345   : > { %s527_s1 = scalar_lea.vmem %s5005_s7, %s3044_s5  ;;  %s530_s28 = scalar_lea.vmem %s5006_s8, %s4119_s4  ;;  %v649_v40 = vlaneseq  ;;  %vm862_vm9 = vcmask 162816   ;;  %vm992_vm10 = vcmask 64512   ;;  %vm2389_vm12 = vcmask 1043456  }
 0x346   : > { %3600 = vmatprep.subr.bf16.mxu0 %v3599_v12  ;;  %v528_v14 = vld [vmem:[%s527_s1] sm:$0xff]  ;;  %v529_v15 = vld [vmem:[%s527_s1 + $0x8] sm:$0xff]  ;;  %s638_s26 = scalar_lea.vmem %s5007_s9, %s3142_s24  ;;  %s645_s29 = smul.u32 3, %s4119_s4  ;;  %vm4497_vm11 = vmpackc.low %vm862_vm9, %vm862_vm9  ;;  %vm2338_vm13 = vcmask 326656   ;;  %vm2343_vm14 = vcmask 490496   ;;  %vm2348_vm15 = vcmask 654336  }
 0x347   : > { %3602 = vmatpush3.bf16.msra.mxu0 %v3599_v12  ;;  %v3607_v16 = vpack.c.bf16 %v529_v15, %v528_v14  ;;  %v640_v17 = vld [vmem:[%s638_s26 + $0x8] sm:$0xff]  ;;  %v643_v18 = vld [vmem:[%s638_s26 + $0x20] sm:$0xff]  ;;  %v642_v21 = vld [vmem:[%s638_s26 + $0x18] sm:$0xff]  ;;  %v650_v42 = vshrl.u32 %v649_v40, 7  ;;  %s4122_s23 = smov 8   ;;  %s4123_s1 = smov 28  }
 0x348   : > { %3604 = vmatprep.subr.bf16.mxu0 %v3603_v13  ;;  %v3611_v19 = vpack.c.bf16 %v643_v18, %v640_v17  ;;  %v639_v20 = vld [vmem:[%s638_s26] sm:$0xff]  ;;  %v641_v27 = vld [vmem:[%s638_s26 + $0x10] sm:$0xff]  ;;  %v644_v28 = vld [vmem:[%s638_s26 + $0x28] sm:$0xff]  ;;  %s646_s22 = scalar_lea.vmem %s5008_s10, %s645_s29  ;;  %s4124_s24 = smov 76   ;;  %vm2376_vm1 = vcmask 818176   ;;  %vm2689_vm2 = vcmask 523264  }
 0x349   : > { %3608 = vmatprep.subr.bf16.mxu1 %v3607_v16  ;;  %v3613_v23 = vpack.c.bf16 %v642_v21, %v639_v20  ;;  %v3615_v29 = vpack.c.bf16 %v644_v28, %v641_v27  ;;  %v3045_v31 = vld [vmem:[%s530_s28] ss:$0 sm:$0xff]  ;;  %v651_v43 = vsub.s32 0, %v650_v42  ;;  %v655_v45 = vsub.s32 1, %v650_v42  ;;  %s4125_s2 = smov 116   ;;  %s4126_s25 = smov 108  }
 0x34a   : > { %3610 = vmatpush3.bf16.msra.mxu1 %v3607_v16  ;;  %v647_v44 = vld [vmem:[%s646_s22] sm:$0x7]  ;;  %v659_v48 = vsub.s32 2, %v650_v42  ;;  %s4127_s26 = smov 96   ;;  %s4128_s27 = smov 88  }
 0x34b   : > { %3606 = vmatpush3.bf16.msra.mxu0 %v3603_v13  ;;  %3612 = vmatprep.subr.bf16.mxu1 %v3611_v19  ;;  %v652_v50 = vrot.slane %v647_v44, %v651_v43  ;;  %v656_v51 = vrot.slane %v647_v44, %v655_v45  ;;  %s4129_s3 = smov 68   ;;  %s4130_s28 = smov 48  }
 0x34c   : > { %3616 = vmatprep.subr.bf16.mxu0 %v3615_v29  ;;  %v660_v52 = vrot.slane %v647_v44, %v659_v48  ;;  %s4131_s29 = smov 56   ;;  %s4132_s0 = smov 16  }
 0x34d   : > { %s4133_s30 = smov 36   ;;  %s4134_s22 = smov 104  }
 0x34e   : > { %3347 = vmatmul.mubr.msk.f32.vlgmr.msra.gmra.mrb[0].mxu0 %vm77_vm0, %v4292_v47 }
 0x34f   : > { %3349 = vmatprep.mubr.msk.f32.mxu0 %vm77_vm0, %v4296_v49  ;;  %3618 = vmatpush3.bf16.msra.mxu0 %v3615_v29 }
 0x352   : > { %3350 = vmatmul.mubr.msk.f32.gmra.mrb[2].mxu0 %vm77_vm0, %v4290_v46 }
 0x421   : > { %v3348_v22 = vpop.f32.mrb[0].mxu0 }
 0x422   : > { %v507_v24 = vpop.f32.mrb[1].mxu0 }
 0x423   : > { %3356 = vmatprep.mubr.msk.f32.mxu1 %vm538_vm8, %v507_v24 }
 0x424   : > { %3357 = vmatmul.mubr.msk.f32.vlgmr.msra.gmra.mrb[0].mxu1 %vm538_vm8, %v3348_v22 }
 0x425   : > { %v3351_v25 = vpop.f32.mrb[2].mxu0  ;;  %3614 = vmatpush1.bf16.msra.mxu1 %v3613_v23 }
 0x426   : > { %v517_v26 = vpop.f32.mrb[3].mxu0 }
 0x427   : > { %3359 = vmatprep.mubr.msk.f32.mxu1 %vm538_vm8, %v517_v26 }
 0x428   : > { %3360 = vmatmul.mubr.msk.f32.gmra.mrb[2].mxu1 %vm538_vm8, %v3351_v25 }
 0x429   : > { %740 = vmatprep.mubr.f32.mxu1 %v4121_v30 }
 0x4f7   : > { %v3358_v32 = vpop.f32.mrb[0].mxu1 }
 0x4f8   : > { %v617_v33 = vpop.f32.mrb[1].mxu1  ;;  %v4402_v35 = vadd.f32 %v3358_v32, %v3045_v31 }
 0x4f9   : > { %v4400_v34 = vadd.f32 %v3045_v31, %v617_v33 }
 0x4fb   : > { %v3361_v36 = vpop.f32.mrb[2].mxu1  ;;  %3051 = vmatmul.mubr.msk.f32.vlgmr.msra.gmra.mrb[4].mxu1 %vm538_vm8, %v4400_v34  ;;  %3366 = vmatprep.mubr.msk.f32.mxu0 %vm538_vm8, %v4400_v34 }
 0x4fc   : > { %v4408_v37 = vadd.f32 %v3361_v36, %v3045_v31  ;;  %v627_v38 = vpop.f32.mrb[3].mxu1  ;;  %3367 = vmatmul.mubr.msk.f32.vlgmr.msra.gmra.mrb[4].mxu0 %vm538_vm8, %v4402_v35  ;;  %746 = vmatprep.mubr.f32.mxu1 %v4121_v30 }
 0x4fd   : > { %v4412_v39 = vadd.f32 %v3045_v31, %v627_v38 }
 0x4ff   : > { %3052 = vmatmul.mubr.msk.f32.gmra.mrb[6].mxu1 %vm538_vm8, %v4402_v35  ;;  %3369 = vmatprep.mubr.msk.f32.mxu0 %vm538_vm8, %v4412_v39 }
 0x500   : > { %3370 = vmatmul.mubr.msk.f32.gmra.mrb[6].mxu0 %vm538_vm8, %v4408_v37  ;;  %752 = vmatprep.mubr.f32.mxu1 %v4121_v30 }
 0x503   : > { %3053 = vmatmul.mubr.msk.f32.gmra.mrb[8].mxu1 %vm538_vm8, %v4412_v39 }
 0x504   : > { %758 = vmatprep.mubr.f32.mxu1 %v4121_v30 }
 0x507   : > { %3054 = vmatmul.mubr.msk.f32.gmra.mrb[10].mxu1 %vm538_vm8, %v4408_v37 }
 0x5ce   : > { %v742_v53 = vpop.f32.mrb[4].mxu1 }
 0x5cf   : > { %v4428_v54 = vadd.f32 %v742_v53, %v652_v50  ;;  %v744_v55 = vpop.f32.mrb[5].mxu1  ;;  %v3368_v56 = vpop.f32.mrb[4].mxu0 }
 0x5d0   : > { %v4430_v57 = vadd.f32 %v744_v55, %v656_v51  ;;  %v4432_v58 = vadd.f32 %v3368_v56, %v660_v52  ;;  %v831_v59 = vpop.f32.mrb[5].mxu0 }
 0x5d1   : > { %v4434_v0 = vadd.f32 %v831_v59, %v660_v52  ;;  %3380 = vmatprep.mubr.msk.f32.mxu1 %vm862_vm9, %v4428_v54 }
 0x5d2   : > { %v748_v1 = vpop.f32.mrb[6].mxu1  ;;  %v3846_v2 = vpack.i.bf16 %v4430_v57, %v4428_v54 }
 0x5d3   : > { %v4440_v4 = vadd.f32 %v748_v1, %v652_v50  ;;  %v750_v6 = vpop.f32.mrb[7].mxu1  ;;  %v3371_v7 = vpop.f32.mrb[6].mxu0  ;;  %v3911_v8 = vpack.i.bf16 %v4434_v0, %v4430_v57  ;;  %v4446_v10 = vpack.i.bf16 %v4432_v58, %v4434_v0 }
 0x5d4   : > { %v4448_v12 = vadd.f32 %v750_v6, %v656_v51  ;;  %v4450_v13 = vadd.f32 %v3371_v7, %v660_v52  ;;  %3847 = vrot.lane.b32.xlu1 %v3846_v2, %s4122_s23  ;;  %v841_v14 = vpop.f32.mrb[7].mxu0 }
 0x5d5   : > { %v842_v15 = vadd.f32 %v841_v14, %v660_v52  ;;  %v3841_v16 = vpack.i.bf16 %v4440_v4, %v4428_v54 }
 0x5d6   : > { %v754_v17 = vpop.f32.mrb[8].mxu1  ;;  %v3851_v18 = vpack.i.bf16 %v4448_v12, %v4440_v4  ;;  %v3876_v19 = vpack.i.bf16 %v4448_v12, %v4430_v57  ;;  %v3916_v22 = vpack.i.bf16 %v4432_v58, %v4448_v12 }
 0x5d7   : > { %v4459_v20 = vadd.f32 %v754_v17, %v652_v50  ;;  %3842 = vrot.lane.b32.xlu0 %v3841_v16, %s4123_s1  ;;  %v756_v21 = vpop.f32.mrb[9].mxu1  ;;  %v4465_v24 = vpack.i.bf16 %v4450_v13, %v842_v15 }
 0x5d8   : > { %v757_v23 = vadd.f32 %v756_v21, %v656_v51  ;;  %3852 = vrot.lane.b32.xlu1 %v3851_v18, %s4122_s23 }
 0x5da   : > { %v760_v25 = vpop.f32.mrb[10].mxu1  ;;  %v3866_v26 = vpack.i.bf16 %v757_v23, %v4459_v20  ;;  %v3921_v27 = vpack.i.bf16 %v842_v15, %v757_v23 }
 0x5db   : > { %v4468_v28 = vadd.f32 %v760_v25, %v652_v50  ;;  %v762_v29 = vpop.f32.mrb[11].mxu1 }
 0x5dc   : > { %v763_v30 = vadd.f32 %v762_v29, %v656_v51  ;;  %3867 = vrot.lane.b32.xlu1 %v3866_v26, %s4122_s23 }
 0x5dd   : > { %v3856_v31 = vpack.i.bf16 %v4468_v28, %v4459_v20 }
 0x5de   : > { %v3886_v32 = vpack.i.bf16 %v763_v30, %v757_v23  ;;  %v3936_v33 = vpack.i.bf16 %v4450_v13, %v763_v30  ;;  %v3881_v36 = vpack.i.bf16 %v763_v30, %v4468_v28 }
 0x5df   : > { %3857 = vrot.lane.b32.xlu0 %v3856_v31, %s4123_s1  ;;  %s2353_s1 = smul.u32 104, %s4119_s4 }
 0x5e0   : > { %3877 = vrot.lane.b32.xlu1 %v3876_v19, %s4124_s24 }
 0x5e3   : > { %3862 = vrot.lane.b32.xlu0 %v3876_v19, %s4125_s2 }
 0x5e4   : > { %966 = vrot.lane.b32.xlu1 %v4440_v4, %s4126_s25 }
 0x5e7   : > { %3872 = vrot.lane.b32.xlu0 %v3876_v19, %s4127_s26 }
 0x5e8   : > { %3887 = vrot.lane.b32.xlu1 %v3886_v32, %s4125_s2  ;;  %s2681_s2 = scalar_lea.vmem %s5016_s18, %s4119_s4 }
 0x5eb   : > { %964 = vrot.lane.b32.xlu0 %v4428_v54, %s4126_s25 }
 0x5ec   : > { %1100 = vrot.lane.b32.xlu1 %v4440_v4, %s4128_s27 }
 0x5ef   : > { %3882 = vrot.lane.b32.xlu0 %v3881_v36, %s4122_s23  ;;  %s4135_s23 = smov 124  }
 0x5f0   : > { %970 = vrot.lane.b32.xlu1 %v4468_v28, %s4126_s25 }
 0x5f3   : > { %1098 = vrot.lane.b32.xlu0 %v4428_v54, %s4128_s27 }
 0x5f4   : > { %1104 = vrot.lane.b32.xlu1 %v4468_v28, %s4128_s27 }
 0x5f7   : > { %968 = vrot.lane.b32.xlu0 %v4459_v20, %s4126_s25 }
 0x5f8   : > { %3897 = vrot.lane.b32.xlu1 %v3886_v32, %s4124_s24  ;;  %s4136_s24 = smov 20  }
 0x5fb   : > { %1102 = vrot.lane.b32.xlu0 %v4459_v20, %s4128_s27  ;;  %s4137_s27 = smov 40  }
 0x5fc   : > { %1217 = vrot.lane.b32.xlu1 %v4440_v4, %s4129_s3 }
 0x5ff   : > { %3892 = vrot.lane.b32.xlu0 %v3886_v32, %s4127_s26  ;;  %s4843_s26 = scalar_lea.vmem %s5009_s11, %s2353_s1  ;;  %s2559_s1 = scalar_lea.vmem %s5013_s15, %s3044_s5 }
 0x600   : > { %1334 = vrot.lane.b32.xlu1 %v4440_v4, %s4130_s28  ;;  %s2791_s5 = scalar_lea.vmem %s5017_s19, %s4119_s4 }
 0x603   : > { %1215 = vrot.lane.b32.xlu0 %v4428_v54, %s4129_s3 }
 0x604   : > { %1221 = vrot.lane.b32.xlu1 %v4468_v28, %s4129_s3 }
 0x607   : > { %1332 = vrot.lane.b32.xlu0 %v4428_v54, %s4130_s28 }
 0x608   : > { %1338 = vrot.lane.b32.xlu1 %v4468_v28, %s4130_s28 }
 0x60b   : > { %1219 = vrot.lane.b32.xlu0 %v4459_v20, %s4129_s3  ;;  %s4138_s3 = smov 60  }
 0x60c   : > { %3902 = vrot.lane.b32.xlu1 %v3876_v19, %s4131_s29 }
 0x60f   : > { %1336 = vrot.lane.b32.xlu0 %v4459_v20, %s4130_s28  ;;  %s4139_s28 = smov 80  }
 0x610   : > { %3912 = vrot.lane.b32.xlu1 %v3911_v8, %s4132_s0 }
 0x613   : > { %3907 = vrot.lane.b32.xlu0 %v3876_v19, %s4133_s30 }
 0x614   : > { %3917 = vrot.lane.b32.xlu1 %v3916_v22, %s4132_s0 }
 0x618   : > { %3922 = vrot.lane.b32.xlu1 %v3921_v27, %s4132_s0 }
 0x61c   : > { %3927 = vrot.lane.b32.xlu1 %v3886_v32, %s4131_s29 }
 0x620   : > { %3932 = vrot.lane.b32.xlu1 %v3886_v32, %s4133_s30  ;;  %s2368_s30 = scalar_lea.vmem %s5010_s12, %s4119_s4 }
 0x624   : > { %3937 = vrot.lane.b32.xlu1 %v3936_v33, %s4132_s0  ;;  %s2484_s0 = scalar_lea.vmem %s5012_s14, %s4119_s4 }
 0x646   : > { %v3848_v38 = vpop.permute.xlu1 %3847 }
 0x647   : > { %v3850_v40 = vunpack.i.h.bf16 %v3848_v38  ;;  %v3849_v42 = vunpack.i.l.bf16 %v3848_v38 }
 0x649   : > { %v3843_v43 = vpop.permute.xlu0 %3842  ;;  %v993_v54 = vsel %vm992_vm10, %v3849_v42, %v3850_v40 }
 0x64a   : > { %v3845_v44 = vunpack.i.h.bf16 %v3843_v43  ;;  %v3844_v45 = vunpack.i.l.bf16 %v3843_v43  ;;  %v3853_v48 = vpop.permute.xlu1 %3852 }
 0x64b   : > { %v3855_v50 = vunpack.i.h.bf16 %v3853_v48  ;;  %v3854_v51 = vunpack.i.l.bf16 %v3853_v48 }
 0x64c   : > { %v3619_v53 = vpack.c.bf16 %v3845_v44, %v3844_v45 }
 0x64d   : > { %v994_v55 = vsel %vm992_vm10, %v3854_v51, %v3855_v50 }
 0x64e   : > { %3621 = vmatprep.subr.msk.bf16.mxu1 %vm4497_vm11, %v3619_v53  ;;  %v3868_v56 = vpop.permute.xlu1 %3867  ;;  %v3631_v57 = vpack.c.bf16 %v994_v55, %v993_v54 }
 0x64f   : > { %3624 = vmatpush3.bf16.xpose.msk.msra.mxu1 %vm4497_vm11, %v3619_v53  ;;  %v3870_v22 = vunpack.i.h.bf16 %v3868_v56  ;;  %v3869_v23 = vunpack.i.l.bf16 %v3868_v56 }
 0x650   : > { %3633 = vmatprep.subr.msk.bf16.mxu0 %vm4497_vm11, %v3631_v57 }
 0x651   : > { %3636 = vmatpush3.bf16.xpose.msk.msra.mxu0 %vm4497_vm11, %v3631_v57  ;;  %v3858_v58 = vpop.permute.xlu0 %3857 }
 0x652   : > { %v3860_v59 = vunpack.i.h.bf16 %v3858_v58  ;;  %v3859_v0 = vunpack.i.l.bf16 %v3858_v58  ;;  %v3878_v1 = vpop.permute.xlu1 %3877 }
 0x653   : > { %v3880_v26 = vunpack.i.h.bf16 %v3878_v1  ;;  %v3879_v27 = vunpack.i.l.bf16 %v3878_v1 }
 0x654   : > { %v3625_v2 = vpack.c.bf16 %v3860_v59, %v3859_v0 }
 0x655   : > { %v3863_v6 = vpop.permute.xlu0 %3862  ;;  %v3667_v40 = vpack.c.bf16 %v3880_v26, %v3879_v27 }
 0x656   : > { %v3865_v7 = vunpack.i.h.bf16 %v3863_v6  ;;  %v3864_v8 = vunpack.i.l.bf16 %v3863_v6  ;;  %v967_v12 = vpop.permute.xlu1 %966  ;;  %3627 = vmatprep.subr.msk.bf16.mxu1 %vm4497_vm11, %v3625_v2 }
 0x657   : > { %3630 = vmatpush3.bf16.xpose.msk.msra.mxu1 %vm4497_vm11, %v3625_v2 }
 0x658   : > { %v3643_v13 = vpack.c.bf16 %v3865_v7, %v3864_v8 }
 0x659   : > { %v3873_v14 = vpop.permute.xlu0 %3872 }
 0x65a   : > { %v3888_v15 = vpop.permute.xlu1 %3887  ;;  %3645 = vmatprep.subr.msk.bf16.mxu1 %vm4497_vm11, %v3643_v13  ;;  %v3874_v32 = vunpack.i.l.bf16 %v3873_v14 }
 0x65b   : > { %v3890_v16 = vunpack.i.h.bf16 %v3888_v15  ;;  %v3889_v17 = vunpack.i.l.bf16 %v3888_v15 }
 0x65d   : > { %v3649_v18 = vpack.c.bf16 %v3890_v16, %v3889_v17  ;;  %v965_v19 = vpop.permute.xlu0 %964 }
 0x65e   : > { %v1101_v21 = vpop.permute.xlu1 %1100  ;;  %3381 = vmatmul.mubr.msk.f32.vlgmr.msra.gmra.mrb[12].mxu1 %vm862_vm9, %v4440_v4  ;;  %3394 = vmatprep.mubr.msk.f32.mxu0 %vm862_vm9, %v965_v19  ;;  %v3875_v4 = vunpack.i.h.bf16 %v3873_v14 }
 0x65f   : > { %3383 = vmatprep.mubr.msk.f32.mxu1 %vm862_vm9, %v4459_v20  ;;  %3648 = vmatpush3.bf16.xpose.msk.msra.mxu1 %vm4497_vm11, %v3643_v13  ;;  %v995_v20 = vsel %vm992_vm10, %v3869_v23, %v3870_v22 }
 0x660   : > { %3651 = vmatprep.subr.msk.bf16.mxu1 %vm4497_vm11, %v3649_v18  ;;  %v3655_v43 = vpack.c.bf16 %v3875_v4, %v3874_v32 }
 0x661   : > { %v3883_v25 = vpop.permute.xlu0 %3882 }
 0x662   : > { %v3885_v29 = vunpack.i.h.bf16 %v3883_v25  ;;  %v3884_v30 = vunpack.i.l.bf16 %v3883_v25  ;;  %v971_v31 = vpop.permute.xlu1 %970  ;;  %3384 = vmatmul.mubr.msk.f32.gmra.mrb[14].mxu1 %vm862_vm9, %v4468_v28 }
 0x664   : > { %v996_v33 = vsel %vm992_vm10, %v3884_v30, %v3885_v29 }
 0x665   : > { %v1099_v36 = vpop.permute.xlu0 %1098  ;;  %v3637_v38 = vpack.c.bf16 %v996_v33, %v995_v20 }
 0x666   : > { %v1105_v42 = vpop.permute.xlu1 %1104  ;;  %3408 = vmatprep.mubr.msk.f32.mxu1 %vm862_vm9, %v1099_v36 }
 0x667   : > { %3639 = vmatprep.subr.msk.bf16.mxu0 %vm4497_vm11, %v3637_v38  ;;  %3654 = vmatpush3.bf16.xpose.msk.msra.mxu1 %vm4497_vm11, %v3649_v18 }
 0x668   : > { %3642 = vmatpush3.bf16.xpose.msk.msra.mxu0 %vm4497_vm11, %v3637_v38  ;;  %3669 = vmatprep.subr.msk.bf16.mxu1 %vm4497_vm11, %v3667_v40 }
 0x669   : > { %v969_v28 = vpop.permute.xlu0 %968  ;;  %3657 = vmatprep.subr.msk.bf16.mxu0 %vm4497_vm11, %v3655_v43 }
 0x66a   : > { %v3898_v44 = vpop.permute.xlu1 %3897 }
 0x66b   : > { %v3900_v45 = vunpack.i.h.bf16 %v3898_v44  ;;  %v3899_v48 = vunpack.i.l.bf16 %v3898_v44 }
 0x66d   : > { %v3673_v50 = vpack.c.bf16 %v3900_v45, %v3899_v48  ;;  %v1103_v51 = vpop.permute.xlu0 %1102 }
 0x66e   : > { %v1218_v53 = vpop.permute.xlu1 %1217  ;;  %3409 = vmatmul.mubr.msk.f32.vlgmr.msra.gmra.mrb[16].mxu1 %vm862_vm9, %v1101_v21 }
 0x66f   : > { %3395 = vmatmul.mubr.msk.f32.vlgmr.msra.gmra.mrb[8].mxu0 %vm862_vm9, %v967_v12  ;;  %3411 = vmatprep.mubr.msk.f32.mxu1 %vm862_vm9, %v1103_v51 }
 0x670   : > { %3672 = vmatpush3.bf16.xpose.msk.msra.mxu1 %vm4497_vm11, %v3667_v40  ;;  %3397 = vmatprep.mubr.msk.f32.mxu0 %vm862_vm9, %v969_v28 }
 0x671   : > { %3660 = vmatpush3.bf16.xpose.msk.msra.mxu0 %vm4497_vm11, %v3655_v43  ;;  %3675 = vmatprep.subr.msk.bf16.mxu1 %vm4497_vm11, %v3673_v50  ;;  %v3893_v54 = vpop.permute.xlu0 %3892 }
 0x672   : > { %v3895_v55 = vunpack.i.h.bf16 %v3893_v54  ;;  %v3894_v56 = vunpack.i.l.bf16 %v3893_v54  ;;  %v1335_v57 = vpop.permute.xlu1 %1334  ;;  %3412 = vmatmul.mubr.msk.f32.gmra.mrb[18].mxu1 %vm862_vm9, %v1105_v42 }
 0x673   : > { %3398 = vmatmul.mubr.msk.f32.gmra.mrb[10].mxu0 %vm862_vm9, %v971_v31 }
 0x674   : > { %v3661_v58 = vpack.c.bf16 %v3895_v55, %v3894_v56 }
 0x675   : > { %v1216_v59 = vpop.permute.xlu0 %1215 }
 0x676   : > { %v1222_v0 = vpop.permute.xlu1 %1221  ;;  %3663 = vmatprep.subr.msk.bf16.mxu0 %vm4497_vm11, %v3661_v58  ;;  %3422 = vmatprep.mubr.msk.f32.mxu0 %vm862_vm9, %v1216_v59 }
 0x678   : > { %3678 = vmatpush3.bf16.xpose.msk.msra.mxu1 %vm4497_vm11, %v3673_v50 }
 0x679   : > { %3666 = vmatpush3.bf16.xpose.msk.msra.mxu0 %vm4497_vm11, %v3661_v58  ;;  %v1333_v1 = vpop.permute.xlu0 %1332 }
 0x67a   : > { %v1339_v2 = vpop.permute.xlu1 %1338  ;;  %3436 = vmatprep.mubr.msk.f32.mxu1 %vm862_vm9, %v1333_v1 }
 0x67d   : > { %v1220_v6 = vpop.permute.xlu0 %1219 }
 0x67e   : > { %v3903_v7 = vpop.permute.xlu1 %3902 }
 0x67f   : > { %v3905_v8 = vunpack.i.h.bf16 %v3903_v7  ;;  %v3904_v12 = vunpack.i.l.bf16 %v3903_v7  ;;  %3437 = vmatmul.mubr.msk.f32.vlgmr.msra.gmra.mrb[20].mxu1 %vm862_vm9, %v1335_v57 }
 0x680   : > { %3423 = vmatmul.mubr.msk.f32.vlgmr.msra.gmra.mrb[12].mxu0 %vm862_vm9, %v1218_v53 }
 0x681   : > { %v3679_v13 = vpack.c.bf16 %v3905_v8, %v3904_v12  ;;  %3425 = vmatprep.mubr.msk.f32.mxu0 %vm862_vm9, %v1220_v6  ;;  %v1337_v14 = vpop.permute.xlu0 %1336 }
 0x682   : > { %v3913_v15 = vpop.permute.xlu1 %3912  ;;  %3439 = vmatprep.mubr.msk.f32.mxu1 %vm862_vm9, %v1337_v14 }
 0x683   : > { %3440 = vmatmul.mubr.msk.f32.gmra.mrb[22].mxu1 %vm862_vm9, %v1339_v2  ;;  %3680 = vmatprep.subr.bf16.mxu0 %v3679_v13  ;;  %v3915_v52 = vunpack.i.h.bf16 %v3913_v15  ;;  %v3914_v16 = vunpack.i.l.bf16 %v3913_v15 }
 0x684   : > { %3426 = vmatmul.mubr.msk.f32.gmra.mrb[14].mxu0 %vm862_vm9, %v1222_v0 }
 0x685   : > { %3682 = vmatpush3.bf16.msra.mxu0 %v3679_v13  ;;  %v1947_v21 = vsel %vm538_vm8, %v3914_v16, %v3915_v52  ;;  %v3908_v26 = vpop.permute.xlu0 %3907 }
 0x686   : > { %v3918_v17 = vpop.permute.xlu1 %3917  ;;  %v3910_v29 = vunpack.i.h.bf16 %v3908_v26  ;;  %v3909_v30 = vunpack.i.l.bf16 %v3908_v26 }
 0x687   : > { %v3920_v18 = vunpack.i.h.bf16 %v3918_v17  ;;  %v3919_v19 = vunpack.i.l.bf16 %v3918_v17 }
 0x688   : > { %v4571_v33 = vpack.c.bf16 %v3910_v29, %v3909_v30 }
 0x689   : > { %v1948_v22 = vsel %vm538_vm8, %v3919_v19, %v3920_v18 }
 0x68a   : > { %v3923_v23 = vpop.permute.xlu1 %3922  ;;  %v3695_v25 = vpack.c.bf16 %v1948_v22, %v1947_v21 }
 0x68b   : > { %v3925_v36 = vunpack.i.h.bf16 %v3923_v23  ;;  %v3924_v38 = vunpack.i.l.bf16 %v3923_v23 }
 0x68c   : > { %3696 = vmatprep.subr.bf16.mxu1 %v3695_v25 }
 0x68d   : > { %3698 = vmatpush3.bf16.msra.mxu1 %v3695_v25  ;;  %v1949_v28 = vsel %vm538_vm8, %v3924_v38, %v3925_v36 }
 0x68e   : > { %v3928_v27 = vpop.permute.xlu1 %3927 }
 0x68f   : > { %v3930_v31 = vunpack.i.h.bf16 %v3928_v27  ;;  %v3929_v4 = vunpack.i.l.bf16 %v3928_v27 }
 0x691   : > { %v3683_v32 = vpack.c.bf16 %v3930_v31, %v3929_v4 }
 0x692   : > { %v4569_v20 = vpop.permute.xlu1 %3932 }
 0x693   : > { %3684 = vmatprep.subr.bf16.mxu0 %v3683_v32 }
 0x694   : > { %3686 = vmatpush3.bf16.msra.mxu0 %v3683_v32 }
 0x695   : > { %3688 = vmatprep.subr.bf16.mxu0 %v4571_v33 }
 0x696   : > { %v3938_v40 = vpop.permute.xlu1 %3937 }
 0x697   : > { %v3940_v42 = vunpack.i.h.bf16 %v3938_v40  ;;  %v3939_v43 = vunpack.i.l.bf16 %v3938_v40 }
 0x699   : > { %v1950_v44 = vsel %vm538_vm8, %v3939_v43, %v3940_v42 }
 0x69a   : > { %v3699_v45 = vpack.c.bf16 %v1950_v44, %v1949_v28 }
 0x69c   : > { %3700 = vmatprep.subr.bf16.mxu1 %v3699_v45 }
 0x69d   : > { %3702 = vmatpush3.bf16.msra.mxu1 %v3699_v45 }
 0x731   : > { %v3382_v48 = vpop.f32.mrb[12].mxu1 }
 0x732   : > { %v1450_v50 = vmul.f32 0.2236068, %v3382_v48  ;;  %v945_v51 = vpop.f32.mrb[13].mxu1 }
 0x733   : > { %v1449_v53 = vmul.f32 0.2236068, %v945_v51 }
 0x734   : > { %v4577_v54 = vadd.f32 %v1450_v50, %v4321_v61 }
 0x735   : > { %v4580_v55 = vadd.f32 %v1449_v53, %v4316_v60  ;;  %v3385_v56 = vpop.f32.mrb[14].mxu1 }
 0x736   : > { %v955_v57 = vpop.f32.mrb[15].mxu1  ;;  %v1492_v58 = vsel %vm77_vm0, %v4577_v54, -inf  ;;  %v1452_v6 = vmul.f32 0.2236068, %v3385_v56 }
 0x737   : > { %1493 = vmax.xlane.f32.xlu1 %v1492_v58  ;;  %v1489_v59 = vsel %vm77_vm0, %v4580_v55, -inf  ;;  %v1451_v18 = vmul.f32 0.2236068, %v955_v57 }
 0x738   : > { %1490 = vmax.xlane.f32.xlu0 %v1489_v59  ;;  %v4593_v17 = vadd.f32 %v1452_v6, %v4331_v63 }
 0x739   : > { %v4603_v27 = vadd.f32 %v1451_v18, %v4326_v62 }
 0x73a   : > { %v1498_v30 = vsel %vm77_vm0, %v4593_v17, -inf }
 0x73b   : > { %v1495_v38 = vsel %vm77_vm0, %v4603_v27, -inf }
 0x741   : > { %v3410_v0 = vpop.f32.mrb[16].mxu1 }
 0x742   : > { %v3396_v1 = vpop.f32.mrb[8].mxu0  ;;  %v1196_v2 = vpop.f32.mrb[17].mxu1  ;;  %v1458_v32 = vmul.f32 0.2236068, %v3410_v0 }
 0x743   : > { %v1454_v7 = vmul.f32 0.2236068, %v3396_v1  ;;  %v1079_v8 = vpop.f32.mrb[9].mxu0  ;;  %v1457_v22 = vmul.f32 0.2236068, %v1196_v2 }
 0x744   : > { %v1453_v12 = vmul.f32 0.2236068, %v1079_v8  ;;  %v4620_v43 = vadd.f32 %v1458_v32, %v4321_v61 }
 0x745   : > { %v4587_v13 = vadd.f32 %v1454_v7, %v4321_v61  ;;  %v3413_v14 = vpop.f32.mrb[18].mxu1  ;;  %v4608_v31 = vadd.f32 %v1457_v22, %v4316_v60 }
 0x746   : > { %v4590_v15 = vadd.f32 %v1453_v12, %v4316_v60  ;;  %v3399_v52 = vpop.f32.mrb[10].mxu0  ;;  %v1206_v16 = vpop.f32.mrb[19].mxu1  ;;  %v1460_v57 = vmul.f32 0.2236068, %v3413_v14  ;;  %v1516_v2 = vsel %vm77_vm0, %v4620_v43, -inf }
 0x747   : > { %v1089_v19 = vpop.f32.mrb[11].mxu0  ;;  %v1504_v21 = vsel %vm77_vm0, %v4587_v13, -inf  ;;  %v1456_v29 = vmul.f32 0.2236068, %v3399_v52  ;;  %v1513_v40 = vsel %vm77_vm0, %v4608_v31, -inf }
 0x748   : > { %v1455_v23 = vmul.f32 0.2236068, %v1089_v19  ;;  %1505 = vmax.xlane.f32.xlu0 %v1504_v21  ;;  %v1501_v25 = vsel %vm77_vm0, %v4590_v15, -inf  ;;  %v1459_v51 = vmul.f32 0.2236068, %v1206_v16  ;;  %v4638_v14 = vadd.f32 %v1460_v57, %v4331_v63 }
 0x749   : > { %1502 = vmax.xlane.f32.xlu1 %v1501_v25  ;;  %v4613_v36 = vadd.f32 %v1456_v29, %v4331_v63 }
 0x74a   : > { %v4600_v26 = vadd.f32 %v1455_v23, %v4326_v62  ;;  %v4633_v7 = vadd.f32 %v1459_v51, %v4326_v62  ;;  %v1522_v25 = vsel %vm77_vm0, %v4638_v14, -inf }
 0x74b   : > { %v1510_v45 = vsel %vm77_vm0, %v4613_v36, -inf }
 0x74c   : > { %1499 = vmax.xlane.f32.xlu0 %v1498_v30  ;;  %v1507_v4 = vsel %vm77_vm0, %v4600_v26, -inf  ;;  %v1519_v21 = vsel %vm77_vm0, %v4633_v7, -inf }
 0x74d   : > { %1508 = vmax.xlane.f32.xlu1 %v1507_v4 }
 0x750   : > { %1496 = vmax.xlane.f32.xlu0 %v1495_v38 }
 0x751   : > { %1514 = vmax.xlane.f32.xlu1 %v1513_v40 }
 0x752   : > { %v3438_v42 = vpop.f32.mrb[20].mxu1 }
 0x753   : > { %v3424_v28 = vpop.f32.mrb[12].mxu0  ;;  %v1430_v44 = vpop.f32.mrb[21].mxu1  ;;  %v1466_v22 = vmul.f32 0.2236068, %v3438_v42 }
 0x754   : > { %v1462_v48 = vmul.f32 0.2236068, %v3424_v28  ;;  %v1313_v50 = vpop.f32.mrb[13].mxu0  ;;  %1511 = vmax.xlane.f32.xlu0 %v1510_v45  ;;  %v1465_v18 = vmul.f32 0.2236068, %v1430_v44 }
 0x755   : > { %v1461_v53 = vmul.f32 0.2236068, %v1313_v50  ;;  %v4658_v32 = vadd.f32 %v1466_v22, %v4321_v61 }
 0x756   : > { %v3441_v56 = vpop.f32.mrb[22].mxu1  ;;  %v4625_v58 = vadd.f32 %v1462_v48, %v4321_v61  ;;  %v4653_v29 = vadd.f32 %v1465_v18, %v4316_v60 }
 0x757   : > { %v4628_v59 = vadd.f32 %v1461_v53, %v4316_v60  ;;  %v3427_v0 = vpop.f32.mrb[14].mxu0  ;;  %v1440_v1 = vpop.f32.mrb[23].mxu1  ;;  %v1468_v38 = vmul.f32 0.2236068, %v3441_v56  ;;  %v1540_v45 = vsel %vm77_vm0, %v4658_v32, -inf }
 0x758   : > { %v1323_v6 = vpop.f32.mrb[15].mxu0  ;;  %1517 = vmax.xlane.f32.xlu0 %v1516_v2  ;;  %v1464_v52 = vmul.f32 0.2236068, %v3427_v0  ;;  %v1528_v16 = vsel %vm77_vm0, %v4625_v58, -inf  ;;  %v1467_v30 = vmul.f32 0.2236068, %v1440_v1 }
 0x759   : > { %v1463_v8 = vmul.f32 0.2236068, %v1323_v6  ;;  %v1525_v12 = vsel %vm77_vm0, %v4628_v59, -inf  ;;  %v1537_v28 = vsel %vm77_vm0, %v4653_v29, -inf  ;;  %v4668_v44 = vadd.f32 %v1468_v38, %v4331_v63 }
 0x75a   : > { %1526 = vmax.xlane.f32.xlu1 %v1525_v12  ;;  %v4648_v23 = vadd.f32 %v1464_v52, %v4331_v63  ;;  %v4663_v42 = vadd.f32 %v1467_v30, %v4326_v62 }
 0x75b   : > { %v4643_v19 = vadd.f32 %v1463_v8, %v4326_v62  ;;  %v1546_v50 = vsel %vm77_vm0, %v4668_v44, -inf }
 0x75c   : > { %1529 = vmax.xlane.f32.xlu0 %v1528_v16  ;;  %v1534_v40 = vsel %vm77_vm0, %v4648_v23, -inf  ;;  %v1543_v48 = vsel %vm77_vm0, %v4663_v42, -inf }
 0x75d   : > { %v1531_v4 = vsel %vm77_vm0, %v4643_v19, -inf }
 0x75e   : > { %1520 = vmax.xlane.f32.xlu1 %v1519_v21 }
 0x760   : > { %1523 = vmax.xlane.f32.xlu0 %v1522_v25 }
 0x762   : > { %1532 = vmax.xlane.f32.xlu1 %v1531_v4 }
 0x764   : > { %1535 = vmax.xlane.f32.xlu0 %v1534_v40 }
 0x766   : > { %1538 = vmax.xlane.f32.xlu1 %v1537_v28 }
 0x768   : > { %1541 = vmax.xlane.f32.xlu0 %v1540_v45 }
 0x76a   : > { %1544 = vmax.xlane.f32.xlu1 %v1543_v48 }
 0x76c   : > { %1547 = vmax.xlane.f32.xlu0 %v1546_v50 }
 0x77b   : > { %3947 = vrot.lane.b32.xlu1 %v4446_v10, %s4134_s22 }
 0x782   : > { %3942 = vrot.lane.b32.xlu0 %v4446_v10, %s4135_s23 }
 0x7c4   : > { %v1494_v51 = vpop.xlane.xlu1 %1493 }
 0x7c5   : > { %v1550_v53 = vsub.f32 %v4577_v54, %v1494_v51  ;;  %v1491_v56 = vpop.xlane.xlu0 %1490 }
 0x7c6   : > { %v1549_v57 = vsub.f32 %v4580_v55, %v1491_v56 }
 0x7c7   : > { %v1571_v0 = vmul.f32 1.442695, %v1550_v53 }
 0x7c8   : > { %v1569_v1 = vmul.f32 1.442695, %v1549_v57 }
 0x7c9   : > { %3961 = vpow2.f32 %v1571_v0 }
 0x7ca   : > { %3963 = vpow2.f32 %v1569_v1 }
 0x7d3   : > { %v4682_v2 = vpop.eup %3961 }
 0x7d4   : > { %v4684_v6 = vpop.eup %3963  ;;  %v1612_v8 = vsel %vm77_vm0, %v4682_v2, 0.0 }
 0x7d5   : > { %v1506_v12 = vpop.xlane.xlu0 %1505  ;;  %1613 = vadd.xlane.f32.xlu0 %v1612_v8  ;;  %v1609_v10 = vsel %vm77_vm0, %v4684_v6, 0.0 }
 0x7d6   : > { %v1554_v54 = vsub.f32 %v4587_v13, %v1506_v12  ;;  %v1503_v52 = vpop.xlane.xlu1 %1502  ;;  %1610 = vadd.xlane.f32.xlu1 %v1609_v10 }
 0x7d7   : > { %v1553_v55 = vsub.f32 %v4590_v15, %v1503_v52 }
 0x7d8   : > { %v1579_v16 = vmul.f32 1.442695, %v1554_v54 }
 0x7d9   : > { %v1577_v18 = vmul.f32 1.442695, %v1553_v55  ;;  %v1500_v21 = vpop.xlane.xlu0 %1499 }
 0x7da   : > { %3965 = vpow2.f32 %v1579_v16  ;;  %v1552_v22 = vsub.f32 %v4593_v17, %v1500_v21  ;;  %v1509_v25 = vpop.xlane.xlu1 %1508 }
 0x7db   : > { %3967 = vpow2.f32 %v1577_v18  ;;  %v1555_v4 = vsub.f32 %v4600_v26, %v1509_v25 }
 0x7dc   : > { %v1575_v30 = vmul.f32 1.442695, %v1552_v22 }
 0x7dd   : > { %v1497_v38 = vpop.xlane.xlu0 %1496  ;;  %v1581_v28 = vmul.f32 1.442695, %v1555_v4 }
 0x7de   : > { %3969 = vpow2.f32 %v1575_v30  ;;  %v1551_v40 = vsub.f32 %v4603_v27, %v1497_v38  ;;  %v1515_v13 = vpop.xlane.xlu1 %1514 }
 0x7df   : > { %v1557_v15 = vsub.f32 %v4608_v31, %v1515_v13 }
 0x7e0   : > { %v1573_v45 = vmul.f32 1.442695, %v1551_v40 }
 0x7e1   : > { %v1512_v48 = vpop.xlane.xlu0 %1511  ;;  %v1585_v17 = vmul.f32 1.442695, %v1557_v15 }
 0x7e2   : > { %3971 = vpow2.f32 %v1573_v45  ;;  %v1556_v50 = vsub.f32 %v4613_v36, %v1512_v48 }
 0x7e3   : > { %3973 = vpow2.f32 %v1581_v28 }
 0x7e4   : > { %v4697_v51 = vpop.eup %3965  ;;  %v1583_v53 = vmul.f32 1.442695, %v1556_v50 }
 0x7e5   : > { %v4699_v56 = vpop.eup %3967  ;;  %v1518_v26 = vpop.xlane.xlu0 %1517  ;;  %v1624_v27 = vsel %vm77_vm0, %v4697_v51, 0.0 }
 0x7e6   : > { %3975 = vpow2.f32 %v1583_v53  ;;  %v1558_v57 = vsub.f32 %v4620_v43, %v1518_v26  ;;  %1625 = vadd.xlane.f32.xlu0 %v1624_v27  ;;  %v1621_v31 = vsel %vm77_vm0, %v4699_v56, 0.0 }
 0x7e7   : > { %v1527_v0 = vpop.xlane.xlu1 %1526  ;;  %1622 = vadd.xlane.f32.xlu1 %v1621_v31  ;;  %3977 = vpow2.f32 %v1585_v17 }
 0x7e8   : > { %v4706_v36 = vpop.eup %3969  ;;  %v1587_v1 = vmul.f32 1.442695, %v1558_v57  ;;  %v1561_v8 = vsub.f32 %v4628_v59, %v1527_v0 }
 0x7e9   : > { %v1530_v12 = vpop.xlane.xlu0 %1529  ;;  %v1618_v10 = vsel %vm77_vm0, %v4706_v36, 0.0 }
 0x7ea   : > { %3979 = vpow2.f32 %v1587_v1  ;;  %v1593_v54 = vmul.f32 1.442695, %v1561_v8  ;;  %v1562_v43 = vsub.f32 %v4625_v58, %v1530_v12  ;;  %1619 = vadd.xlane.f32.xlu0 %v1618_v10 }
 0x7eb   : > { %v1521_v52 = vpop.xlane.xlu1 %1520 }
 0x7ec   : > { %v4712_v55 = vpop.eup %3971  ;;  %3981 = vpow2.f32 %v1593_v54  ;;  %v1595_v16 = vmul.f32 1.442695, %v1562_v43  ;;  %v1559_v18 = vsub.f32 %v4633_v7, %v1521_v52 }
 0x7ed   : > { %v1524_v21 = vpop.xlane.xlu0 %1523  ;;  %v1615_v59 = vsel %vm77_vm0, %v4712_v55, 0.0  ;;  %v4717_v22 = vpop.eup %3973 }
 0x7ee   : > { %3983 = vpow2.f32 %v1595_v16  ;;  %v1589_v25 = vmul.f32 1.442695, %v1559_v18  ;;  %v1560_v30 = vsub.f32 %v4638_v14, %v1524_v21  ;;  %1616 = vadd.xlane.f32.xlu1 %v1615_v59  ;;  %v1627_v28 = vsel %vm77_vm0, %v4717_v22, 0.0 }
 0x7ef   : > { %v1533_v58 = vpop.xlane.xlu1 %1532 }
 0x7f0   : > { %v4720_v4 = vpop.eup %3975  ;;  %3985 = vpow2.f32 %v1589_v25  ;;  %v1591_v38 = vmul.f32 1.442695, %v1560_v30  ;;  %v1563_v40 = vsub.f32 %v4643_v19, %v1533_v58 }
 0x7f1   : > { %v1536_v13 = vpop.xlane.xlu0 %1535  ;;  %v1630_v7 = vsel %vm77_vm0, %v4720_v4, 0.0  ;;  %v4727_v45 = vpop.eup %3977 }
 0x7f2   : > { %3987 = vpow2.f32 %v1591_v38  ;;  %v1564_v14 = vsub.f32 %v4648_v23, %v1536_v13  ;;  %1631 = vadd.xlane.f32.xlu0 %v1630_v7  ;;  %1628 = vadd.xlane.f32.xlu1 %v1627_v28  ;;  %v1597_v15 = vmul.f32 1.442695, %v1563_v40  ;;  %v1633_v27 = vsel %vm77_vm0, %v4727_v45, 0.0 }
 0x7f3   : > { %v1539_v48 = vpop.xlane.xlu1 %1538 }
 0x7f4   : > { %v4730_v50 = vpop.eup %3979  ;;  %v1599_v17 = vmul.f32 1.442695, %v1564_v14  ;;  %v1565_v19 = vsub.f32 %v4653_v29, %v1539_v48 }
 0x7f5   : > { %v1542_v53 = vpop.xlane.xlu0 %1541  ;;  %v1636_v26 = vsel %vm77_vm0, %v4730_v50, 0.0 }
 0x7f6   : > { %v4737_v57 = vpop.eup %3981  ;;  %3989 = vpow2.f32 %v1599_v17  ;;  %v1601_v23 = vmul.f32 1.442695, %v1565_v19  ;;  %v1566_v31 = vsub.f32 %v4658_v32, %v1542_v53  ;;  %1637 = vadd.xlane.f32.xlu0 %v1636_v26  ;;  %1634 = vadd.xlane.f32.xlu1 %v1633_v27 }
 0x7f7   : > { %3991 = vpow2.f32 %v1597_v15  ;;  %v1545_v0 = vpop.xlane.xlu1 %1544  ;;  %v1645_v10 = vsel %vm77_vm0, %v4737_v57, 0.0 }
 0x7f8   : > { %v4740_v1 = vpop.eup %3983  ;;  %3993 = vpow2.f32 %v1601_v23  ;;  %v1603_v29 = vmul.f32 1.442695, %v1566_v31  ;;  %v1567_v32 = vsub.f32 %v4663_v42, %v1545_v0 }
 0x7f9   : > { %v1548_v8 = vpop.xlane.xlu0 %1547  ;;  %v1648_v12 = vsel %vm77_vm0, %v4740_v1, 0.0 }
 0x7fa   : > { %v4746_v54 = vpop.eup %3985  ;;  %v1568_v43 = vsub.f32 %v4668_v44, %v1548_v8  ;;  %1649 = vadd.xlane.f32.xlu0 %v1648_v12  ;;  %1646 = vadd.xlane.f32.xlu1 %v1645_v10  ;;  %3995 = vpow2.f32 %v1603_v29  ;;  %v1605_v42 = vmul.f32 1.442695, %v1567_v32  ;;  %v3935_v29 = vunpack.i.h.bf16 %v4569_v20 }
 0x7fb   : > { %v3948_v52 = vpop.permute.xlu1 %3947  ;;  %v1639_v30 = vsel %vm77_vm0, %v4746_v54, 0.0  ;;  %v3934_v8 = vunpack.i.l.bf16 %v4569_v20 }
 0x7fc   : > { %v4750_v16 = vpop.eup %3987  ;;  %v1607_v18 = vmul.f32 1.442695, %v1568_v43  ;;  %v3950_v21 = vunpack.i.h.bf16 %v3948_v52  ;;  %v3949_v59 = vunpack.i.l.bf16 %v3948_v52 }
 0x7fd   : > { %v1642_v25 = vsel %vm77_vm0, %v4750_v16, 0.0  ;;  %v3943_v26 = vpop.permute.xlu0 %3942  ;;  %v3691_v43 = vpack.c.bf16 %v3935_v29, %v3934_v8 }
 0x7fe   : > { %v4756_v58 = vpack.c.bf16 %v3950_v21, %v3949_v59  ;;  %1643 = vadd.xlane.f32.xlu0 %v1642_v25  ;;  %1640 = vadd.xlane.f32.xlu1 %v1639_v30  ;;  %3997 = vpow2.f32 %v1607_v18  ;;  %v3945_v32 = vunpack.i.h.bf16 %v3943_v26 }
 0x7ff   : > { %3999 = vpow2.f32 %v1605_v42 }
 0x800   : > { %v4758_v44 = vpop.eup %3989  ;;  %3712 = vmatprep.subr.bf16.mxu1 %v4756_v58 }
 0x801   : > { %v4761_v38 = vpop.eup %3991  ;;  %v1654_v40 = vsel %vm77_vm0, %v4758_v44, 0.0 }
 0x802   : > { %v4765_v13 = vpop.eup %3993  ;;  %1655 = vadd.xlane.f32.xlu0 %v1654_v40  ;;  %v1651_v28 = vsel %vm77_vm0, %v4761_v38, 0.0 }
 0x803   : > { %v1657_v7 = vsel %vm77_vm0, %v4765_v13, 0.0 }
 0x804   : > { %1658 = vadd.xlane.f32.xlu1 %v1657_v7  ;;  %v4771_v14 = vpop.eup %3995 }
 0x805   : > { %v1660_v15 = vsel %vm77_vm0, %v4771_v14, 0.0 }
 0x806   : > { %1652 = vadd.xlane.f32.xlu0 %v1651_v28 }
 0x808   : > { %v4775_v48 = vpop.eup %3997 }
 0x809   : > { %v1666_v17 = vsel %vm77_vm0, %v4775_v48, 0.0  ;;  %v4779_v19 = vpop.eup %3999 }
 0x80a   : > { %1661 = vadd.xlane.f32.xlu0 %v1660_v15  ;;  %v1663_v53 = vsel %vm77_vm0, %v4779_v19, 0.0 }
 0x80e   : > { %1667 = vadd.xlane.f32.xlu0 %v1666_v17 }
 0x812   : > { %1664 = vadd.xlane.f32.xlu0 %v1663_v53 }
 0x815   : > { %3957 = vrot.lane.b32.xlu1 %v4465_v24, %s4134_s22 }
 0x828   : > { %3952 = vrot.lane.b32.xlu0 %v4465_v24, %s4135_s23  ;;  %v3944_v24 = vunpack.i.l.bf16 %v3943_v26  ;;  %s2562_s23 = scalar_lea.vmem %s5014_s16, %s4119_s4 }
 0x82a   : > { %v3703_v18 = vpack.c.bf16 %v3945_v32, %v3944_v24 }
 0x862   : > { %v1614_v27 = vpop.xlane.xlu0 %1613 }
 0x863   : > { %4001 = vrcp.f32 %v1614_v27  ;;  %v1611_v23 = vpop.xlane.xlu1 %1610 }
 0x864   : > { %4003 = vrcp.f32 %v1611_v23 }
 0x86d   : > { %v4002_v31 = vpop.eup %4001 }
 0x86e   : > { %v4004_v0 = vpop.eup %4003  ;;  %v1690_v10 = vmul.f32 %v4002_v31, %v4682_v2 }
 0x86f   : > { %v1689_v12 = vmul.f32 %v4004_v0, %v4684_v6 }
 0x871   : > { %3450 = vmatprep.mubr.msk.f32.mxu0 %vm77_vm0, %v1689_v12 }
 0x872   : > { %3451 = vmatmul.mubr.msk.f32.vlgmr.msra.gmra.mrb[16].mxu0 %vm77_vm0, %v1690_v10 }
 0x873   : > { %3690 = vmatpush3.bf16.msra.mxu0 %v4571_v33  ;;  %v1626_v52 = vpop.xlane.xlu0 %1625 }
 0x874   : > { %3692 = vmatprep.subr.bf16.mxu0 %v3691_v43  ;;  %v1623_v21 = vpop.xlane.xlu1 %1622 }
 0x875   : > { %4005 = vrcp.f32 %v1623_v21 }
 0x877   : > { %3694 = vmatpush3.bf16.msra.mxu0 %v3691_v43  ;;  %v1620_v59 = vpop.xlane.xlu0 %1619 }
 0x878   : > { %3704 = vmatprep.subr.bf16.mxu0 %v3703_v18  ;;  %4007 = vrcp.f32 %v1620_v59 }
 0x87b   : > { %v1617_v20 = vpop.xlane.xlu1 %1616 }
 0x87c   : > { %4009 = vrcp.f32 %v1617_v20 }
 0x87d   : > { %4011 = vrcp.f32 %v1626_v52 }
 0x87f   : > { %v1632_v2 = vpop.xlane.xlu0 %1631  ;;  %v1629_v6 = vpop.xlane.xlu1 %1628 }
 0x880   : > { %4013 = vrcp.f32 %v1629_v6  ;;  %v4006_v42 = vpop.eup %4005 }
 0x881   : > { %4015 = vrcp.f32 %v1632_v2  ;;  %v1693_v26 = vmul.f32 %v4006_v42, %v4699_v56 }
 0x882   : > { %v4008_v33 = vpop.eup %4007 }
 0x883   : > { %v1638_v25 = vpop.xlane.xlu0 %1637  ;;  %v1635_v30 = vpop.xlane.xlu1 %1634  ;;  %v1692_v17 = vmul.f32 %v4008_v33, %v4706_v36 }
 0x884   : > { %4017 = vrcp.f32 %v1638_v25 }
 0x885   : > { %4019 = vrcp.f32 %v1635_v30 }
 0x886   : > { %v4010_v40 = vpop.eup %4009 }
 0x887   : > { %v1650_v7 = vpop.xlane.xlu0 %1649  ;;  %v1647_v28 = vpop.xlane.xlu1 %1646  ;;  %v1691_v15 = vmul.f32 %v4010_v40, %v4712_v55 }
 0x888   : > { %v4012_v53 = vpop.eup %4011  ;;  %4021 = vrcp.f32 %v1647_v28 }
 0x889   : > { %3453 = vmatprep.mubr.msk.f32.mxu0 %vm77_vm0, %v1691_v15  ;;  %v1694_v0 = vmul.f32 %v4012_v53, %v4697_v51 }
 0x88a   : > { %3454 = vmatmul.mubr.msk.f32.gmra.mrb[18].mxu0 %vm77_vm0, %v1692_v17  ;;  %v4014_v27 = vpop.eup %4013 }
 0x88b   : > { %v1644_v23 = vpop.xlane.xlu0 %1643  ;;  %3464 = vmatprep.mubr.msk.f32.mxu0 %vm77_vm0, %v1693_v26  ;;  %v1641_v31 = vpop.xlane.xlu1 %1640  ;;  %v1695_v36 = vmul.f32 %v4014_v27, %v4717_v22 }
 0x88c   : > { %4023 = vrcp.f32 %v1644_v23  ;;  %v4016_v29 = vpop.eup %4015 }
 0x88d   : > { %4025 = vrcp.f32 %v1641_v31  ;;  %v1696_v43 = vmul.f32 %v4016_v29, %v4720_v4  ;;  %v2356_v29 = vld [vmem:[%s4843_s26 + $0x8] sm:$0xff] }
 0x88e   : > { %v4018_v55 = vpop.eup %4017  ;;  %3465 = vmatmul.mubr.msk.f32.vlgmr.msra.gmra.mrb[20].mxu0 %vm77_vm0, %v1694_v0 }
 0x88f   : > { %v4020_v8 = vpop.eup %4019  ;;  %v1698_v56 = vmul.f32 %v4018_v55, %v4730_v50  ;;  %3706 = vmatpush3.bf16.msra.mxu0 %v3703_v18  ;;  %v1656_v12 = vpop.xlane.xlu0 %1655  ;;  %3467 = vmatprep.mubr.msk.f32.mxu0 %vm77_vm0, %v1695_v36  ;;  %v2357_v36 = vld [vmem:[%s4843_s26 + $0x10] sm:$0xff] }
 0x890   : > { %v1697_v10 = vmul.f32 %v4020_v8, %v4727_v45 }
 0x891   : > { %v1659_v51 = vpop.xlane.xlu1 %1658 }
 0x892   : > { %4027 = vrcp.f32 %v1659_v51  ;;  %3478 = vmatprep.mubr.msk.f32.mxu1 %vm77_vm0, %v1697_v10  ;;  %3468 = vmatmul.mubr.msk.f32.gmra.mrb[22].mxu0 %vm77_vm0, %v1696_v43  ;;  %v4022_v22 = vpop.eup %4021 }
 0x893   : > { %3479 = vmatmul.mubr.msk.f32.vlgmr.msra.gmra.mrb[24].mxu1 %vm77_vm0, %v1698_v56  ;;  %v1653_v32 = vpop.xlane.xlu0 %1652  ;;  %v1701_v50 = vmul.f32 %v4022_v22, %v4737_v57  ;;  %v2358_v56 = vld [vmem:[%s4843_s26 + $0x18] sm:$0xff] }
 0x894   : > { %3714 = vmatpush3.bf16.msra.mxu1 %v4756_v58  ;;  %v3723_v43 = vpack.c.bf16 %v2358_v56, %v2357_v36 }
 0x895   : > { %v3958_v24 = vpop.permute.xlu1 %3957  ;;  %3492 = vmatprep.mubr.msk.f32.mxu0 %vm77_vm0, %v1701_v50  ;;  %v2359_v50 = vld [vmem:[%s4843_s26 + $0x20] sm:$0xff] }
 0x896   : > { %v4024_v52 = vpop.eup %4023  ;;  %v3960_v18 = vunpack.i.h.bf16 %v3958_v24  ;;  %v3959_v45 = vunpack.i.l.bf16 %v3958_v24  ;;  %v2360_v24 = vld [vmem:[%s4843_s26 + $0x28] sm:$0xff] }
 0x897   : > { %v4026_v4 = vpop.eup %4025  ;;  %v1662_v21 = vpop.xlane.xlu0 %1661  ;;  %v1700_v59 = vmul.f32 %v4024_v52, %v4750_v16  ;;  %v3727_v52 = vpack.c.bf16 %v2360_v24, %v2359_v50 }
 0x898   : > { %v3715_v20 = vpack.c.bf16 %v3960_v18, %v3959_v45  ;;  %4029 = vrcp.f32 %v1662_v21  ;;  %v1699_v2 = vmul.f32 %v4026_v4, %v4746_v54  ;;  %v2361_v18 = vld [vmem:[%s4843_s26 + $0x30] sm:$0xff]  ;;  %v2362_v45 = vld [vmem:[%s4843_s26 + $0x38] sm:$0xff] }
 0x899   : > { %4031 = vrcp.f32 %v1650_v7  ;;  %v3731_v21 = vpack.c.bf16 %v2362_v45, %v2361_v18 }
 0x89a   : > { %3481 = vmatprep.mubr.msk.f32.mxu1 %vm77_vm0, %v1699_v2  ;;  %3716 = vmatprep.subr.bf16.mxu1 %v3715_v20  ;;  %4033 = vrcp.f32 %v1653_v32  ;;  %v2364_v2 = vld [vmem:[%s4843_s26 + $0x48] sm:$0xff] }
 0x89b   : > { %3482 = vmatmul.mubr.msk.f32.gmra.mrb[26].mxu1 %vm77_vm0, %v1700_v59  ;;  %v1668_v57 = vpop.xlane.xlu0 %1667 }
 0x89c   : > { %v4028_v58 = vpop.eup %4027  ;;  %3718 = vmatpush3.bf16.msra.mxu1 %v3715_v20  ;;  %4035 = vrcp.f32 %v1668_v57  ;;  %v2363_v20 = vld [vmem:[%s4843_s26 + $0x40] sm:$0xff] }
 0x89d   : > { %v1705_v6 = vmul.f32 %v4028_v58, %v4765_v13  ;;  %v3735_v57 = vpack.c.bf16 %v2364_v2, %v2363_v20 }
 0x89f   : > { %3506 = vmatprep.mubr.msk.f32.mxu1 %vm77_vm0, %v1705_v6  ;;  %v1665_v16 = vpop.xlane.xlu0 %1664  ;;  %v2365_v6 = vld [vmem:[%s4843_s26 + $0x50] sm:$0xff] }
 0x8a0   : > { %4037 = vrcp.f32 %v1665_v16  ;;  %v2366_v16 = vld [vmem:[%s4843_s26 + $0x58] sm:$0xff] }
 0x8a1   : > { %4039 = vrcp.f32 %v1656_v12 }
 0x8a2   : > { %v4030_v25 = vpop.eup %4029 }
 0x8a3   : > { %v1706_v54 = vmul.f32 %v4030_v25, %v4771_v14  ;;  %v3953_v30 = vpop.permute.xlu0 %3952  ;;  %v4032_v28 = vpop.eup %4031 }
 0x8a4   : > { %v3955_v42 = vunpack.i.h.bf16 %v3953_v30  ;;  %v3954_v33 = vunpack.i.l.bf16 %v3953_v30  ;;  %v4034_v7 = vpop.eup %4033  ;;  %v1702_v17 = vmul.f32 %v4032_v28, %v4740_v1  ;;  %v2367_v28 = vld [vmem:[%s4843_s26 + $0x60] sm:$0xf] }
 0x8a5   : > { %3507 = vmatmul.mubr.msk.f32.vlgmr.msra.gmra.mrb[28].mxu1 %vm77_vm0, %v1706_v54  ;;  %v1703_v26 = vmul.f32 %v4034_v7, %v4761_v38  ;;  %v3739_v54 = vpack.c.bf16 %v2366_v16, %v2365_v6 }
 0x8a6   : > { %v3707_v40 = vpack.c.bf16 %v3955_v42, %v3954_v33  ;;  %v4036_v13 = vpop.eup %4035 }
 0x8a7   : > { %v1708_v27 = vmul.f32 %v4036_v13, %v4775_v48 }
 0x8a8   : > { %3708 = vmatprep.subr.bf16.mxu0 %v3707_v40 }
 0x8a9   : > { %3710 = vmatpush3.bf16.msra.mxu0 %v3707_v40 }
 0x8aa   : > { %v4038_v15 = vpop.eup %4037 }
 0x8ab   : > { %v4040_v53 = vpop.eup %4039  ;;  %v1707_v14 = vmul.f32 %v4038_v15, %v4779_v19 }
 0x8ac   : > { %3493 = vmatmul.mubr.msk.f32.vlgmr.msra.gmra.mrb[24].mxu0 %vm77_vm0, %v1702_v17  ;;  %v1704_v23 = vmul.f32 %v4040_v53, %v4758_v44  ;;  %v2355_v44 = vld [vmem:[%s4843_s26] sm:$0xff] }
 0x8ad   : > { %3495 = vmatprep.mubr.msk.f32.mxu0 %vm77_vm0, %v1703_v26  ;;  %3509 = vmatprep.mubr.msk.f32.mxu1 %vm77_vm0, %v1707_v14  ;;  %v3719_v8 = vpack.c.bf16 %v2356_v29, %v2355_v44 }
 0x8ae   : > { %3510 = vmatmul.mubr.msk.f32.gmra.mrb[30].mxu1 %vm77_vm0, %v1708_v27 }
 0x8af   : > { %3720 = vmatprep.subr.bf16.mxu0 %v3719_v8 }
 0x8b0   : > { %3496 = vmatmul.mubr.msk.f32.gmra.mrb[26].mxu0 %vm77_vm0, %v1704_v23 }
 0x8b1   : > { %3722 = vmatpush3.bf16.msra.mxu0 %v3719_v8 }
 0x8b2   : > { %3724 = vmatprep.subr.bf16.mxu0 %v3723_v43 }
 0x8b5   : > { %3726 = vmatpush3.bf16.msra.mxu0 %v3723_v43 }
 0x8b6   : > { %3728 = vmatprep.subr.bf16.mxu0 %v3727_v52 }
 0x8b9   : > { %3730 = vmatpush3.bf16.msra.mxu0 %v3727_v52 }
 0x8ba   : > { %3732 = vmatprep.subr.bf16.mxu0 %v3731_v21 }
 0x8bd   : > { %3734 = vmatpush3.bf16.msra.mxu0 %v3731_v21 }
 0x8be   : > { %3736 = vmatprep.subr.bf16.mxu0 %v3735_v57 }
 0x8c1   : > { %3738 = vmatpush3.bf16.msra.mxu0 %v3735_v57 }
 0x8c2   : > { %3740 = vmatprep.subr.bf16.mxu0 %v3739_v54 }
 0x8c5   : > { %3742 = vmatpush3.bf16.msra.mxu0 %v3739_v54 }
 0x8c6   : > { %3536 = vmatprep.subr.msk.mxu0 %vm2389_vm12, %v2367_v28 }
 0x8c9   : > { %3537 = vmatpush3.msk.msra.mxu0 %vm2389_vm12, %v2367_v28 }
 0x945   : > { %v4831_v1 = vpop.f32.mrb[16].mxu0 }
 0x946   : > { %v4833_v31 = vpop.f32.mrb[17].mxu0 }
 0x95d   : > { %v4835_v38 = vpop.f32.mrb[18].mxu0 }
 0x95e   : > { %v4837_v19 = vpop.f32.mrb[19].mxu0 }
 0x961   : > { %v3466_v0 = vpop.f32.mrb[20].mxu0 }
 0x962   : > { %2276 = vrot.lane.b32.xlu1 %v3466_v0, %s4136_s24  ;;  %v1908_v48 = vpop.f32.mrb[21].mxu0 }
 0x963   : > { %2274 = vrot.lane.b32.xlu0 %v1908_v48, %s4136_s24 }
 0x965   : > { %v3469_v55 = vpop.f32.mrb[22].mxu0 }
 0x966   : > { %v3480_v12 = vpop.f32.mrb[24].mxu1  ;;  %2280 = vrot.lane.b32.xlu1 %v3469_v55, %s4136_s24  ;;  %v1918_v10 = vpop.f32.mrb[23].mxu0 }
 0x967   : > { %v2033_v51 = vpop.f32.mrb[25].mxu1 }
 0x968   : > { %2290 = vrot.lane.b32.xlu0 %v2033_v51, %s4137_s27 }
 0x96a   : > { %2278 = vrot.lane.b32.xlu1 %v1918_v10, %s4136_s24  ;;  %s3132_s24 = sshll.u32 %s4119_s4, 6 }
 0x96b   : > { %s4911_s26 = scalar_lea.vmem %s5015_s17, %s3132_s24 }
 0x96e   : > { %v3483_v22 = vpop.f32.mrb[26].mxu1  ;;  %2292 = vrot.lane.b32.xlu1 %v3480_v12, %s4137_s27 }
 0x96f   : > { %v2043_v32 = vpop.f32.mrb[27].mxu1 }
 0x978   : > { %v3508_v4 = vpop.f32.mrb[28].mxu1 }
 0x979   : > { %v2251_v59 = vpop.f32.mrb[29].mxu1 }
 0x97f   : > { %v3494_v58 = vpop.f32.mrb[24].mxu0 }
 0x980   : > { %2308 = vrot.lane.b32.xlu1 %v3494_v58, %s4138_s3  ;;  %v2142_v25 = vpop.f32.mrb[25].mxu0 }
 0x981   : > { %2306 = vrot.lane.b32.xlu0 %v2142_v25, %s4138_s3  ;;  %v3511_v30 = vpop.f32.mrb[30].mxu1 }
 0x982   : > { %v2261_v42 = vpop.f32.mrb[31].mxu1 }
 0x983   : > { %v3497_v33 = vpop.f32.mrb[26].mxu0 }
 0x984   : > { %v2152_v40 = vpop.f32.mrb[27].mxu0  ;;  %2296 = vrot.lane.b32.xlu1 %v3483_v22, %s4137_s27 }
 0x985   : > { %2294 = vrot.lane.b32.xlu0 %v2043_v32, %s4137_s27 }
 0x988   : > { %2312 = vrot.lane.b32.xlu1 %v3497_v33, %s4138_s3 }
 0x989   : > { %2310 = vrot.lane.b32.xlu0 %v2152_v40, %s4138_s3  ;;  %s2482_s3 = scalar_lea.vmem %s5011_s13, %s4119_s4 }
 0x98c   : > { %2328 = vrot.lane.b32.xlu1 %v3511_v30, %s4139_s28 }
 0x98d   : > { %2324 = vrot.lane.b32.xlu0 %v3508_v4, %s4139_s28 }
 0x991   : > { %2322 = vrot.lane.b32.xlu0 %v2251_v59, %s4139_s28 }
 0x995   : > { %2326 = vrot.lane.b32.xlu0 %v2261_v42, %s4139_s28  ;;  %s2793_s28 = scalar_lea.vmem %s5018_s20, %s4119_s4  ;;  %s436_s4 = sadd.s32 1, %s4119_s4  }
 0x996   : > { %p433_p0 = scmp.ge.s32.totalorder %s436_s4, 12  }
 0x997   :  { %vm4141_vm3 = vmmov (%p433_p0), 0   ;;  %vm2890_vm0 = vcmask (%p433_p0), 1040384   ;;  %s4143_s9 = smov (%p433_p0), [#allocation2]   ;;  %vm2974_vm4 = vcmask (%p433_p0), 17408  }
 0x998   :  { %s2982_s10 = sshll.u32 (%p433_p0), %s4143_s9, 4  ;;  %s2983_s10 = int_to_ptr.vmem [resolvable:$true] %s2982_s10 }
 0x999   :  { %s4057_s11 = scalar_lea.vmem (%p433_p0), %s2983_s10, 32  ;;  %p4062_p2 = scmp.lt.s32.totalorder (%p433_p0), %s2983_s10, %s2983_s10 }
 0x99a   :  { %p4058_p1 = scmp.ne.s32.totalorder (%p433_p0), %s2983_s10, %s4057_s11  ;;  %p4063_p3 = scmp.lt.s32.totalorder (%p433_p0), %s4057_s11, %s4057_s11 }
 0x99c   :  { %p4064_p4 = por (%p433_p0), %p4063_p3, %p4062_p2 }
 0x99e   :  { %p4065_p5 = pnand (%p433_p0), %p4064_p4, %p4058_p1 }
 0x9d4   : > { %v2277_v7 = vpop.permute.xlu1 %2276 }
 0x9d5   : > { %v2275_v15 = vpop.permute.xlu0 %2274  ;;  %v2335_v55 = vsel %vm862_vm9, %v4831_v1, %v2277_v7 }
 0x9d6   : > { %v2334_v36 = vsel %vm862_vm9, %v4833_v31, %v2275_v15 }
 0x9d8   : > { %v2281_v13 = vpop.permute.xlu1 %2280 }
 0x9d9   : > { %v2337_v1 = vsel %vm862_vm9, %v4835_v38, %v2281_v13  ;;  %v3119_v38 = vld [vmem:[%s2368_s30] ss:$0 sm:$0xff]  ;;  %s5042_s30 = sld [smem:[#allocation10_spill]] (%p433_p0) }
 0x9da   : > { %v2291_v53 = vpop.permute.xlu0 %2290 }
 0x9db   : > { %v2339_v8 = vsel %vm2338_vm13, %v2334_v36, %v2291_v53 }
 0x9dc   : > { %v2279_v17 = vpop.permute.xlu1 %2278 }
 0x9dd   : > { %v2336_v31 = vsel %vm862_vm9, %v4837_v19, %v2279_v17 }
 0x9e0   : > { %v2293_v26 = vpop.permute.xlu1 %2292 }
 0x9e1   : > { %v2340_v56 = vsel %vm2338_vm13, %v2335_v55, %v2293_v26 }
 0x9f2   : > { %v2309_v27 = vpop.permute.xlu1 %2308 }
 0x9f3   : > { %v2307_v14 = vpop.permute.xlu0 %2306  ;;  %v2345_v43 = vsel %vm2343_vm14, %v2340_v56, %v2309_v27 }
 0x9f4   : > { %v2344_v12 = vsel %vm2343_vm14, %v2339_v8, %v2307_v14 }
 0x9f6   : > { %v2297_v0 = vpop.permute.xlu1 %2296 }
 0x9f7   : > { %v2295_v23 = vpop.permute.xlu0 %2294  ;;  %v2342_v24 = vsel %vm2338_vm13, %v2337_v1, %v2297_v0 }
 0x9f8   : > { %v2341_v32 = vsel %vm2338_vm13, %v2336_v31, %v2295_v23  ;;  %v2674_v31 = vld [vmem:[%s4911_s26 + $0x8] sm:$0xff] }
 0x9fa   : > { %v2313_v29 = vpop.permute.xlu1 %2312 }
 0x9fb   : > { %v2311_v48 = vpop.permute.xlu0 %2310  ;;  %v2347_v45 = vsel %vm2343_vm14, %v2342_v24, %v2313_v29 }
 0x9fc   : > { %v2346_v52 = vsel %vm2343_vm14, %v2341_v32, %v2311_v48 }
 0x9fe   : > { %v2329_v50 = vpop.permute.xlu1 %2328 }
 0x9ff   : > { %v2325_v44 = vpop.permute.xlu0 %2324  ;;  %v2352_v4 = vsel %vm2348_vm15, %v2347_v45, %v2329_v50 }
 0xa00   : > { %v2350_v22 = vsel %vm2348_vm15, %v2345_v43, %v2325_v44 }
 0xa03   : > { %v2323_v10 = vpop.permute.xlu0 %2322 }
 0xa04   : > { %v2349_v51 = vsel %vm2348_vm15, %v2344_v12, %v2323_v10  ;;  %v2560_v12 = vld [vmem:[%s2559_s1] sm:$0xff]  ;;  %v2561_v10 = vld [vmem:[%s2559_s1 + $0x8] sm:$0xff] }
 0xa05   : > { %3538 = vmatprep.mubr.msk.f32.mxu0 %vm2376_vm1, %v2349_v51  ;;  %v3743_v43 = vpack.c.bf16 %v2561_v10, %v2560_v12  ;;  %v2673_v51 = vld [vmem:[%s4911_s26] sm:$0xff] }
 0xa06   : > { %3539 = vmatmul.mubr.msk.f32.vlgmr.msra.gmra.mrb[28].mxu0 %vm2376_vm1, %v2350_v22  ;;  %v3747_v22 = vpack.c.bf16 %v2674_v31, %v2673_v51 }
 0xa07   : > { %v2327_v18 = vpop.permute.xlu0 %2326  ;;  %3744 = vmatprep.subr.bf16.mxu1 %v3743_v43 }
 0xa08   : > { %v2351_v19 = vsel %vm2348_vm15, %v2346_v52, %v2327_v18  ;;  %3746 = vmatpush3.bf16.msra.mxu1 %v3743_v43 }
 0xa09   : > { %3541 = vmatprep.mubr.msk.f32.mxu0 %vm2376_vm1, %v2351_v19  ;;  %3748 = vmatprep.subr.bf16.mxu1 %v3747_v22 }
 0xa0a   : > { %3542 = vmatmul.mubr.msk.f32.gmra.mrb[30].mxu0 %vm2376_vm1, %v2352_v4 }
 0xad9   : > { %v3540_v21 = vpop.f32.mrb[28].mxu0 }
 0xada   : > { %v2465_v59 = vadd.f32 %v3540_v21, %v3119_v38  ;;  %v2459_v20 = vpop.f32.mrb[29].mxu0 }
 0xadb   : > { %v2460_v2 = vadd.f32 %v3119_v38, %v2459_v20 }
 0xadc   : > { %v2479_v57 = vadd.f32 %v2465_v59, %v4402_v35 }
 0xadd   : > { %v3543_v58 = vpop.f32.mrb[30].mxu0  ;;  %v2478_v6 = vadd.f32 %v2460_v2, %v4400_v34  ;;  %v3125_v2 = vld [vmem:[%s2482_s3] ss:$0 sm:$0xff] }
 0xade   : > { %v2469_v16 = vpop.f32.mrb[31].mxu0  ;;  %v2489_v25 = vsel %vm538_vm8, %v2479_v57, 0.0  ;;  %v2475_v54 = vadd.f32 %v3543_v58, %v3119_v38 }
 0xadf   : > { %v2470_v30 = vadd.f32 %v3119_v38, %v2469_v16  ;;  %2490 = vadd.xlane.f32.xlu1 %v2489_v25  ;;  %v2486_v42 = vsel %vm538_vm8, %v2478_v6, 0.0  ;;  %v3126_v16 = vld [vmem:[%s2484_s0] ss:$0 sm:$0xff] }
 0xae0   : > { %2487 = vadd.xlane.f32.xlu0 %v2486_v42  ;;  %v2481_v40 = vadd.f32 %v2475_v54, %v4408_v37  ;;  %v2676_v42 = vld [vmem:[%s4911_s26 + $0x18] sm:$0xff] }
 0xae1   : > { %v2480_v33 = vadd.f32 %v2470_v30, %v4412_v39  ;;  %v2675_v30 = vld [vmem:[%s4911_s26 + $0x10] sm:$0xff] }
 0xae2   : > { %v2495_v35 = vsel %vm538_vm8, %v2481_v40, 0.0 }
 0xae3   : > { %v2492_v28 = vsel %vm538_vm8, %v2480_v33, 0.0 }
 0xae4   : > { %2493 = vadd.xlane.f32.xlu0 %v2492_v28 }
 0xae8   : > { %2496 = vadd.xlane.f32.xlu0 %v2495_v35 }
 0xb6c   : > { %v2491_v34 = vpop.xlane.xlu1 %2490 }
 0xb6d   : > { %v2500_v7 = vmul.f32 0.0625, %v2491_v34  ;;  %v2488_v13 = vpop.xlane.xlu0 %2487  ;;  %v3751_v34 = vpack.c.bf16 %v2676_v42, %v2675_v30 }
 0xb6e   : > { %v2499_v15 = vmul.f32 0.0625, %v2488_v13  ;;  %v2677_v13 = vld [vmem:[%s4911_s26 + $0x20] sm:$0xff] }
 0xb6f   : > { %v2504_v17 = vsub.f32 %v2479_v57, %v2500_v7 }
 0xb70   : > { %v2503_v53 = vsub.f32 %v2478_v6, %v2499_v15  ;;  %v2678_v15 = vld [vmem:[%s4911_s26 + $0x28] sm:$0xff] }
 0xb71   : > { %v2494_v26 = vpop.xlane.xlu0 %2493  ;;  %v2508_v14 = vmul.f32 %v2504_v17, %v2504_v17 }
 0xb72   : > { %v2501_v27 = vmul.f32 0.0625, %v2494_v26  ;;  %v2507_v23 = vmul.f32 %v2503_v53, %v2503_v53 }
 0xb73   : > { %v2514_v39 = vsel %vm538_vm8, %v2508_v14, 0.0  ;;  %v3755_v14 = vpack.c.bf16 %v2678_v15, %v2677_v13 }
 0xb74   : > { %v2505_v37 = vsub.f32 %v2480_v33, %v2501_v27  ;;  %2515 = vadd.xlane.f32.xlu0 %v2514_v39  ;;  %v2511_v0 = vsel %vm538_vm8, %v2507_v23, 0.0  ;;  %v2679_v39 = vld [vmem:[%s4911_s26 + $0x30] sm:$0xff] }
 0xb75   : > { %2512 = vadd.xlane.f32.xlu1 %v2511_v0  ;;  %v2497_v48 = vpop.xlane.xlu0 %2496 }
 0xb76   : > { %v2502_v44 = vmul.f32 0.0625, %v2497_v48  ;;  %v2509_v29 = vmul.f32 %v2505_v37, %v2505_v37  ;;  %v3127_v48 = vld [vmem:[%s2562_s23] ss:$0 sm:$0xff] }
 0xb78   : > { %v2506_v36 = vsub.f32 %v2481_v40, %v2502_v44  ;;  %v2517_v55 = vsel %vm538_vm8, %v2509_v29, 0.0 }
 0xb79   : > { %2518 = vadd.xlane.f32.xlu1 %v2517_v55 }
 0xb7a   : > { %v2510_v8 = vmul.f32 %v2506_v36, %v2506_v36 }
 0xb7c   : > { %v2520_v56 = vsel %vm538_vm8, %v2510_v8, 0.0 }
 0xb7d   : > { %2521 = vadd.xlane.f32.xlu0 %v2520_v56 }
 0xc01   : > { %v2516_v1 = vpop.xlane.xlu0 %2515 }
 0xc02   : > { %v2524_v32 = vmul.f32 0.0625, %v2516_v1  ;;  %v2513_v50 = vpop.xlane.xlu1 %2512  ;;  %v3133_v1 = vld [vmem:[%s2681_s2] ss:$0 sm:$0xff] }
 0xc03   : > { %v2523_v24 = vmul.f32 0.0625, %v2513_v50 }
 0xc04   : > { %v2528_v52 = vadd.f32 1e-05, %v2524_v32 }
 0xc05   : > { %v2527_v18 = vadd.f32 1e-05, %v2523_v24 }
 0xc06   : > { %4041 = vrsqrt.f32 %v2528_v52  ;;  %v2519_v45 = vpop.xlane.xlu1 %2518 }
 0xc07   : > { %4043 = vrsqrt.f32 %v2527_v18  ;;  %v2525_v19 = vmul.f32 0.0625, %v2519_v45 }
 0xc09   : > { %v2529_v4 = vadd.f32 1e-05, %v2525_v19 }
 0xc0a   : > { %v2522_v38 = vpop.xlane.xlu0 %2521 }
 0xc0b   : > { %4045 = vrsqrt.f32 %v2529_v4  ;;  %v2526_v21 = vmul.f32 0.0625, %v2522_v38 }
 0xc0d   : > { %v2530_v59 = vadd.f32 1e-05, %v2526_v21 }
 0xc0f   : > { %4047 = vrsqrt.f32 %v2530_v59 }
 0xc10   : > { %v4042_v20 = vpop.eup %4041 }
 0xc11   : > { %v4044_v57 = vpop.eup %4043  ;;  %v2536_v58 = vmul.f32 %v4042_v20, %v2504_v17 }
 0xc12   : > { %v2535_v6 = vmul.f32 %v4044_v57, %v2503_v53 }
 0xc13   : > { %v2546_v25 = vmul.f32 %v3125_v2, %v2536_v58 }
 0xc14   : > { %v2545_v54 = vmul.f32 %v3125_v2, %v2535_v6 }
 0xc15   : > { %v4046_v33 = vpop.eup %4045  ;;  %v2556_v35 = vadd.f32 %v3126_v16, %v2546_v25 }
 0xc16   : > { %v2555_v40 = vadd.f32 %v3126_v16, %v2545_v54  ;;  %v2537_v28 = vmul.f32 %v4046_v33, %v2505_v37  ;;  %v2680_v37 = vld [vmem:[%s4911_s26 + $0x38] sm:$0xff] }
 0xc17   : > { %v3759_v0 = vpack.c.bf16 %v2680_v37, %v2679_v39 }
 0xc18   : > { %3548 = vmatprep.mubr.msk.f32.mxu1 %vm538_vm8, %v2555_v40  ;;  %v2547_v7 = vmul.f32 %v3125_v2, %v2537_v28 }
 0xc19   : > { %v4048_v26 = vpop.eup %4047  ;;  %3549 = vmatmul.mubr.msk.f32.vlgmr.msra.gmra.mrb[32].mxu1 %vm538_vm8, %v2556_v35 }
 0xc1a   : > { %v2557_v17 = vadd.f32 %v3126_v16, %v2547_v7  ;;  %v2538_v53 = vmul.f32 %v4048_v26, %v2506_v36  ;;  %3750 = vmatpush3.bf16.msra.mxu1 %v3747_v22 }
 0xc1b   : > { %3752 = vmatprep.subr.bf16.mxu1 %v3751_v34 }
 0xc1c   : > { %3551 = vmatprep.mubr.msk.f32.mxu1 %vm538_vm8, %v2557_v17  ;;  %v2548_v27 = vmul.f32 %v3125_v2, %v2538_v53 }
 0xc1e   : > { %v2558_v23 = vadd.f32 %v3126_v16, %v2548_v27  ;;  %3754 = vmatpush3.bf16.msra.mxu1 %v3751_v34 }
 0xc1f   : > { %3756 = vmatprep.subr.bf16.mxu1 %v3755_v14 }
 0xc20   : > { %3552 = vmatmul.mubr.msk.f32.gmra.mrb[34].mxu1 %vm538_vm8, %v2558_v23 }
 0xc22   : > { %3758 = vmatpush3.bf16.msra.mxu1 %v3755_v14 }
 0xc23   : > { %3760 = vmatprep.subr.bf16.mxu1 %v3759_v0 }
 0xc26   : > { %3762 = vmatpush3.bf16.msra.mxu1 %v3759_v0 }
 0xcec   : > { %v3550_v44 = vpop.f32.mrb[32].mxu1 }
 0xced   : > { %v2654_v29 = vadd.f32 %v3550_v44, %v3127_v48  ;;  %v2648_v36 = vpop.f32.mrb[33].mxu1 }
 0xcee   : > { %v2649_v55 = vadd.f32 %v3127_v48, %v2648_v36 }
 0xcef   : > { %v2668_v56 = vmax.f32 %v2654_v29, 0.0 }
 0xcf0   : > { %v2667_v8 = vmax.f32 %v2649_v55, 0.0 }
 0xcf2   : > { %3570 = vmatprep.mubr.msk.f32.mxu1 %vm2689_vm2, %v2667_v8 }
 0xcf3   : > { %v3553_v12 = vpop.f32.mrb[34].mxu1  ;;  %3571 = vmatmul.mubr.msk.f32.vlgmr.msra.gmra.mrb[36].mxu1 %vm2689_vm2, %v2668_v56 }
 0xcf4   : > { %v2664_v10 = vadd.f32 %v3553_v12, %v3127_v48  ;;  %v2658_v43 = vpop.f32.mrb[35].mxu1 }
 0xcf5   : > { %v2659_v51 = vadd.f32 %v3127_v48, %v2658_v43 }
 0xcf6   : > { %v2670_v22 = vmax.f32 %v2664_v10, 0.0 }
 0xcf7   : > { %v2669_v31 = vmax.f32 %v2659_v51, 0.0 }
 0xcf9   : > { %3573 = vmatprep.mubr.msk.f32.mxu1 %vm2689_vm2, %v2669_v31  ;;  %v3138_v31 = vld [vmem:[%s2791_s5] ss:$0 sm:$0xff] }
 0xcfa   : > { %3574 = vmatmul.mubr.msk.f32.gmra.mrb[38].mxu1 %vm2689_vm2, %v2670_v22 }
 0xdc6   : > { %v3572_v32 = vpop.f32.mrb[36].mxu1 }
 0xdc7   : > { %v2774_v50 = vadd.f32 %v3572_v32, %v3133_v1  ;;  %v2768_v24 = vpop.f32.mrb[37].mxu1  ;;  %v3139_v32 = vld [vmem:[%s2793_s28] ss:$0 sm:$0xff] }
 0xdc8   : > { %v2769_v52 = vadd.f32 %v3133_v1, %v2768_v24 }
 0xdc9   : > { %v2788_v18 = vadd.f32 %v2774_v50, %v2556_v35 }
 0xdca   : > { %v2787_v45 = vadd.f32 %v2769_v52, %v2555_v40 }
 0xdcb   : > { %v2798_v19 = vsel %vm538_vm8, %v2788_v18, 0.0 }
 0xdcc   : > { %2799 = vadd.xlane.f32.xlu0 %v2798_v19  ;;  %v2795_v4 = vsel %vm538_vm8, %v2787_v45, 0.0 }
 0xdcd   : > { %2796 = vadd.xlane.f32.xlu1 %v2795_v4  ;;  %v3575_v38 = vpop.f32.mrb[38].mxu1 }
 0xdce   : > { %v2784_v21 = vadd.f32 %v3575_v38, %v3133_v1  ;;  %v2778_v59 = vpop.f32.mrb[39].mxu1 }
 0xdcf   : > { %v2779_v20 = vadd.f32 %v3133_v1, %v2778_v59 }
 0xdd0   : > { %v2790_v2 = vadd.f32 %v2784_v21, %v2558_v23 }
 0xdd1   : > { %v2789_v57 = vadd.f32 %v2779_v20, %v2557_v17 }
 0xdd2   : > { %v2804_v58 = vsel %vm538_vm8, %v2790_v2, 0.0 }
 0xdd3   : > { %2805 = vadd.xlane.f32.xlu0 %v2804_v58  ;;  %v2801_v6 = vsel %vm538_vm8, %v2789_v57, 0.0 }
 0xdd4   : > { %2802 = vadd.xlane.f32.xlu1 %v2801_v6 }
 0xe59   : > { %v2800_v16 = vpop.xlane.xlu0 %2799 }
 0xe5a   : > { %v2808_v25 = vmul.f32 0.0625, %v2800_v16  ;;  %v2797_v54 = vpop.xlane.xlu1 %2796 }
 0xe5b   : > { %v2807_v30 = vmul.f32 0.0625, %v2797_v54  ;;  %v2893_v54 = vld [vmem:[%s5042_s30 + $0x8] sm:$0xff] (%p433_p0) }
 0xe5c   : > { %v2812_v42 = vsub.f32 %v2788_v18, %v2808_v25 }
 0xe5d   : > { %v2811_v33 = vsub.f32 %v2787_v45, %v2807_v30 }
 0xe5e   : > { %v2816_v40 = vmul.f32 %v2812_v42, %v2812_v42 }
 0xe5f   : > { %v2815_v28 = vmul.f32 %v2811_v33, %v2811_v33 }
 0xe60   : > { %v2806_v35 = vpop.xlane.xlu0 %2805  ;;  %v2822_v34 = vsel %vm538_vm8, %v2816_v40, 0.0  ;;  %v4142_v40 = vmov (%p433_p0), 0.0  }
 0xe61   : > { %v2810_v7 = vmul.f32 0.0625, %v2806_v35  ;;  %2823 = vadd.xlane.f32.xlu0 %v2822_v34  ;;  %v2803_v13 = vpop.xlane.xlu1 %2802  ;;  %v2819_v15 = vsel %vm538_vm8, %v2815_v28, 0.0  ;;  %3580 = vmatprep.mubr.msk.f32.mxu0 (%p433_p0), %vm4141_vm3, %v4142_v40 }
 0xe62   : > { %v2809_v26 = vmul.f32 0.0625, %v2803_v13  ;;  %2820 = vadd.xlane.f32.xlu1 %v2819_v15 }
 0xe63   : > { %v2814_v17 = vsub.f32 %v2790_v2, %v2810_v7 }
 0xe64   : > { %v2813_v53 = vsub.f32 %v2789_v57, %v2809_v26 }
 0xe65   : > { %v2818_v14 = vmul.f32 %v2814_v17, %v2814_v17 }
 0xe66   : > { %v2817_v27 = vmul.f32 %v2813_v53, %v2813_v53 }
 0xe67   : > { %v2828_v23 = vsel %vm538_vm8, %v2818_v14, 0.0 }
 0xe68   : > { %2829 = vadd.xlane.f32.xlu0 %v2828_v23  ;;  %v2825_v39 = vsel %vm538_vm8, %v2817_v27, 0.0 }
 0xe69   : > { %2826 = vadd.xlane.f32.xlu1 %v2825_v39 }
 0xeee   : > { %v2824_v37 = vpop.xlane.xlu0 %2823 }
 0xeef   : > { %v2832_v0 = vmul.f32 0.0625, %v2824_v37  ;;  %v2821_v48 = vpop.xlane.xlu1 %2820 }
 0xef0   : > { %v2831_v44 = vmul.f32 0.0625, %v2821_v48 }
 0xef1   : > { %v2836_v29 = vadd.f32 1e-05, %v2832_v0 }
 0xef2   : > { %v2835_v36 = vadd.f32 1e-05, %v2831_v44 }
 0xef3   : > { %4049 = vrsqrt.f32 %v2836_v29 }
 0xef4   : > { %4051 = vrsqrt.f32 %v2835_v36 }
 0xef5   : > { %v2830_v55 = vpop.xlane.xlu0 %2829 }
 0xef6   : > { %v2834_v8 = vmul.f32 0.0625, %v2830_v55  ;;  %v2827_v56 = vpop.xlane.xlu1 %2826 }
 0xef7   : > { %v2833_v12 = vmul.f32 0.0625, %v2827_v56 }
 0xef8   : > { %v2838_v10 = vadd.f32 1e-05, %v2834_v8 }
 0xef9   : > { %v2837_v43 = vadd.f32 1e-05, %v2833_v12 }
 0xefa   : > { %4053 = vrsqrt.f32 %v2838_v10 }
 0xefb   : > { %4055 = vrsqrt.f32 %v2837_v43 }
 0xefd   : > { %v4050_v51 = vpop.eup %4049 }
 0xefe   : > { %v4052_v22 = vpop.eup %4051  ;;  %v2844_v1 = vmul.f32 %v4050_v51, %v2812_v42  ;;  %v4140_v42 = vmov (%p433_p0), 0.0|0.0  }
 0xeff   : > { %v2843_v50 = vmul.f32 %v4052_v22, %v2811_v33  ;;  %3763 = vmatprep.subr.bf16.mxu0 (%p433_p0), %v4140_v42 }
 0xf00   : > { %v2854_v24 = vmul.f32 %v3138_v31, %v2844_v1 }
 0xf01   : > { %v2853_v52 = vmul.f32 %v3138_v31, %v2843_v50 }
 0xf02   : > { %v2864_v18 = vadd.f32 %v3139_v32, %v2854_v24 }
 0xf03   : > { %v2863_v45 = vadd.f32 %v3139_v32, %v2853_v52 }
 0xf04   : > { %v4054_v19 = vpop.eup %4053  ;;  %v2868_v4 = vadd.f32 %v4111_v3, %v2864_v18  }
 0xf05   : > { %v4056_v38 = vpop.eup %4055  ;;  %v2867_v21 = vadd.f32 %v4115_v5, %v2863_v45   ;;  %v2846_v59 = vmul.f32 %v4054_v19, %v2814_v17  ;;  %v3140_v17 = vld [vmem:[%s5004_s6] ss:$0 sm:$0xff] (%p433_p0) }
 0xf06   : > { %v2845_v20 = vmul.f32 %v4056_v38, %v2813_v53  ;;  %v5040_v3 = vmov %v2868_v4  ;;  %v2873_v28 = vsel (%p433_p0), %vm538_vm8, %v2868_v4, 0.0 }
 0xf07   : > { %v2856_v2 = vmul.f32 %v3138_v31, %v2846_v59  ;;  %v5041_v5 = vmov %v2867_v21  ;;  %v2872_v30 = vsel (%p433_p0), %vm538_vm8, %v2867_v21, 0.0 }
 0xf08   : > { %v2855_v57 = vmul.f32 %v3138_v31, %v2845_v20  ;;  %435 = sbr.rel (!%p433_p0) target bundleno = 836 (0x344), region = 125  ;;  %v2892_v5 = vld [vmem:[%s5042_s30] sm:$0xff] (%p433_p0)  ;;  %v2874_v46 = vadd.f32 (%p433_p0), %v2873_v28, %v2872_v30 }
 0xf09   : > { %v2866_v58 = vadd.f32 %v3139_v32, %v2856_v2  ;;  %v3764_v33 = vpack.c.bf16 (%p433_p0), %v2893_v54, %v2892_v5 }
 0xf0a   : > { %v2865_v6 = vadd.f32 %v3139_v32, %v2855_v57  ;;  %v2875_v49 = vrot.slane (%p433_p0), %v2874_v46, 4 }
 0xf0b   : > { %v2870_v16 = vadd.f32 %v4103_v9, %v2866_v58   ;;  %3765 = vmatpush3.bf16.msra.mxu0 (%p433_p0), %v3764_v33 }
 0xf0c   : > { %v2869_v25 = vadd.f32 %v4107_v11, %v2865_v6   ;;  %v2876_v61 = vadd.f32 (%p433_p0), %v2875_v49, %v2874_v46 }
 0xf0d   : > { %v5038_v9 = vmov %v2870_v16  ;;  %v2882_v41 = vsel (%p433_p0), %vm538_vm8, %v2870_v16, 0.0 }
 0xf0e   : > { %v5039_v11 = vmov %v2869_v25  ;;  %v2881_v35 = vsel (%p433_p0), %vm538_vm8, %v2869_v25, 0.0  ;;  %v2877_v63 = vrot.slane (%p433_p0), %v2876_v61, 2 }
 0xf0f   :  { %v2883_v47 = vadd.f32 %v2882_v41, %v2881_v35 }
 0xf10   :  { %v2878_v9 = vadd.f32 %v2877_v63, %v2876_v61 }
 0xf11   :  { %v2884_v60 = vrot.slane %v2883_v47, 4 }
 0xf12   :  { %v2879_v34 = vrot.slane %v2878_v9, 1 }
 0xf13   :  { %v2885_v62 = vadd.f32 %v2884_v60, %v2883_v47 }
 0xf14   :  { %v2880_v13 = vadd.f32 %v2879_v34, %v2878_v9 }
 0xf15   :  { %v2886_v3 = vrot.slane %v2885_v62, 2 }
 0xf17   :  { %v2887_v11 = vadd.f32 %v2886_v3, %v2885_v62 }
 0xf19   :  { %v2888_v7 = vrot.slane %v2887_v11, 1 }
 0xf1b   :  { %v2889_v15 = vadd.f32 %v2888_v7, %v2887_v11 }
 0xf1d   :  { %v2891_v26 = vsel %vm2890_vm0, %v2880_v13, %v2889_v15 }
 0xf1e   :  { %3581 = vmatmul.mubr.msk.f32.vlgmr.msra.gmra.mrb[0].mxu0 %vm538_vm8, %v2891_v26 }
 0xff1   :  { %v2970_v53 = vpop.f32.mrb[0].mxu0 }
 0xff2   :  { %v2971_v14 = vadd.f32 %v3140_v17, %v2970_v53  ;;  %v3582_v27 = vpop.f32.mrb[1].mxu0 }
 0xff4   :  { %2975 = vst.msk [vmem:[#allocation2] sm:$0x3] %vm2974_vm4, %v2971_v14 }
 0xff5   :  { %4068 = shalt.err (!%p4065_p5)
}
 0xff6   :  { %s4069_s14 = scalar_lea.hbm %s5019_s21, 32 }
 0xff7   :  { %p4070_p6 = scmp.ne.s32.totalorder %s5019_s21, %s4069_s14  ;;  %p4073_p7 = scmp.lt.u32.totalorder %s4069_s14, %s5019_s21 }
 0xff9   :  { %p4075_p8 = pnand %p4073_p7, %p4070_p6 }
 0xffb   :  { %4078 = shalt.err (!%p4075_p8)
}
 0xffc   :  { %2985 = dma.vmem_to_hbm [thread:$0]  %s2983_s10, 32, %s5019_s21, [#allocation3]  }
 0xffd   :  { %4099 = dma.done.wait [#allocation3], 32  }
 0xffe   :  { %4100 = vsyncadd [#allocation3], 4294967264 }
 0xfff   :  { %2989 = vsyncpa [#allocation3], 1 }

</bundles_post_ra>
